<compile_context>
chip_gen: v5e
topology: v5e:2x2
jax: 0.10.0
libtpu: 0.0.40
codegen_flags: <defaults>
</compile_context>

<pallas_src>
import functools
import math

import jax
import jax.numpy as jnp
from jax import lax
from jax.experimental import pallas as pl
from jax.experimental.pallas import tpu as pltpu

EPS = 1e-5          # nn.LayerNorm default eps
NEG_INF = -1e30     # additive mask value (finite -> no NaN even for fully-masked rows)


def _row_tile(m, cap=512):
    """Largest row tile <= cap that divides m (multiple of 8 when possible)."""
    for t in (cap, 512, 256, 128, 64, 32, 16, 8):
        if t <= m and m % t == 0:
            return t
    return m


# ======================================================================================
# Fused attention block:
#   full-width QKV proj -> per-head SDPA (mask built in-kernel) -> out proj -> +res -> LN
# Grid: (batch, q_tile), both "parallel".  Weights / K / V use constant-in-q index_maps
# so they stay VMEM resident along the inner axis.
# ======================================================================================
def _attn_block_kernel(xq_ref, xkv_ref, mask_ref,
                       wq_ref, bq_ref, wkv_ref, bkv_ref,
                       wo_ref, bo_ref, g_ref, beta_ref, o_ref,
                       *, num_heads, causal):
    cd = wq_ref.dtype                       # matmul operand dtype (f32 or bf16)
    xq = xq_ref[0]                          # (tq, E) f32 -- also the residual
    xkv = xkv_ref[0]                        # (Lk, E) f32
    tq, E = xq.shape
    Lk = xkv.shape[0]
    Dh = E // num_heads
    scale = 1.0 / math.sqrt(Dh)

    xq_c = xq.astype(cd)
    xkv_c = xkv.astype(cd)

    # Full-width projections (big-N MXU matmuls); heads are column slices.
    q_all = jnp.dot(xq_c, wq_ref[...], preferred_element_type=jnp.float32) + bq_ref[...]
    kv_all = jnp.dot(xkv_c, wkv_ref[...], preferred_element_type=jnp.float32) + bkv_ref[...]
    k_all = kv_all[:, :E]
    v_all = kv_all[:, E:]

    # Additive attention bias built on the VPU (no HBM bias tensor).
    bias = jnp.where(mask_ref[0] > 0, 0.0, NEG_INF)                    # (1, Lk)
    if causal:
        q0 = pl.program_id(1) * tq
        row = q0 + lax.broadcasted_iota(jnp.int32, (tq, Lk), 0)
        col = lax.broadcasted_iota(jnp.int32, (tq, Lk), 1)
        bias = bias + jnp.where(col <= row, 0.0, NEG_INF)              # (tq, Lk)

    # Per-head SDPA + per-head contribution to the output projection (N = E each).
    acc = jnp.zeros((tq, E), jnp.float32)
    for h in range(num_heads):
        sl = slice(h * Dh, (h + 1) * Dh)
        q_h = q_all[:, sl]
        k_h = k_all[:, sl]
        v_h = v_all[:, sl]

        # scores: q @ k^T  (MXU, trans_b)
        s = lax.dot_general(q_h.astype(cd), k_h.astype(cd),
                            (((1,), (1,)), ((), ())),
                            preferred_element_type=jnp.float32)
        s = s * scale + bias

        m = jnp.max(s, axis=-1, keepdims=True)
        p = jnp.exp(s - m)
        l = jnp.sum(p, axis=-1, keepdims=True)
        inv_l = pl.reciprocal(l, approx=False)

        o_h = jnp.dot(p.astype(cd), v_h.astype(cd),
                      preferred_element_type=jnp.float32) * inv_l      # (tq, Dh)

        # out-proj contribution of this head: o_h @ wo[h*Dh:(h+1)*Dh, :]
        acc = acc + jnp.dot(o_h.astype(cd), wo_ref[h],
                            preferred_element_type=jnp.float32)

    attn_out = acc + bo_ref[...]                                       # (tq, E)

    # Residual add + LayerNorm (post-LN), fused -- all f32.
    y = xq + attn_out
    mu = jnp.mean(y, axis=-1, keepdims=True)
    var = jnp.mean((y - mu) ** 2, axis=-1, keepdims=True)
    y = (y - mu) * lax.rsqrt(var + EPS)
    o_ref[0] = (y * g_ref[...] + beta_ref[...]).astype(o_ref.dtype)


def attention_block(x_q, x_kv, kv_mask, p, ln_g, ln_b, *, num_heads, causal,
                    compute_dtype=jnp.float32):
    """Fused (attention + residual + LayerNorm). Residual is x_q (== tgt in this layer)."""
    B, Lq, E = x_q.shape
    Lk = x_kv.shape[1]
    H = num_heads
    Dh = E // H
    cd = compute_dtype

    # Weight packing (done at call time here; in real use pack once at load):
    #   Q projection stays (E, E); K and V are fused into one (E, 2E) matmul;
    #   out-proj rows are pre-split per head to (H, Dh, E).
    wq = p["wq"].astype(cd)                                            # (E, E)
    bq = p["bq"].reshape(1, E)
    wkv = jnp.concatenate([p["wk"], p["wv"]], axis=1).astype(cd)       # (E, 2E)
    bkv = jnp.concatenate([p["bk"], p["bv"]], axis=0).reshape(1, 2 * E)
    wo3 = p["wo"].reshape(H, Dh, E).astype(cd)                         # (H, Dh, E)
    bo = p["bo"].reshape(1, E)

    if kv_mask is None:
        kv_mask = jnp.ones((B, Lk), jnp.int32)
    kv_mask = kv_mask.astype(jnp.int32).reshape(B, 1, Lk)

    tq = _row_tile(Lq, cap=128)
    n_qt = Lq // tq

    const3 = lambda b, i: (0, 0, 0)
    const2 = lambda b, i: (0, 0)
    kernel = functools.partial(_attn_block_kernel, num_heads=H, causal=causal)

    return pl.pallas_call(
        kernel,
        out_shape=jax.ShapeDtypeStruct((B, Lq, E), x_q.dtype),
        grid=(B, n_qt),
        in_specs=[
            pl.BlockSpec((1, tq, E), lambda b, i: (b, i, 0)),   # x_q tile (and residual)
            pl.BlockSpec((1, Lk, E), lambda b, i: (b, 0, 0)),   # x_kv (resident across q tiles)
            pl.BlockSpec((1, 1, Lk), lambda b, i: (b, 0, 0)),   # key padding mask
            pl.BlockSpec((E, E), const2),                       # wq
            pl.BlockSpec((1, E), const2),                       # bq
            pl.BlockSpec((E, 2 * E), const2),                   # wk | wv fused
            pl.BlockSpec((1, 2 * E), const2),                   # bk | bv fused
            pl.BlockSpec((H, Dh, E), const3),                   # wo (per-head rows)
            pl.BlockSpec((1, E), const2),                       # bo
            pl.BlockSpec((1, E), const2),                       # ln gamma
            pl.BlockSpec((1, E), const2),                       # ln beta
        ],
        out_specs=pl.BlockSpec((1, tq, E), lambda b, i: (b, i, 0)),
        compiler_params=pltpu.CompilerParams(
            dimension_semantics=("parallel", "parallel")),
    )(x_q, x_kv, kv_mask, wq, bq, wkv, bkv, wo3, bo,
      ln_g.reshape(1, E), ln_b.reshape(1, E))


# ======================================================================================
# Fused FFN block: linear -> exact GELU -> linear -> +residual -> LayerNorm
# Grid: row tiles ("parallel"); weights are constant blocks (VMEM resident).
# ======================================================================================
def _ffn_ln_kernel(x_ref, w1_ref, b1_ref, w2_ref, b2_ref, g_ref, beta_ref, o_ref):
    cd = w1_ref.dtype
    x = x_ref[...]                                                     # (tm, E) f32
    h = jnp.dot(x.astype(cd), w1_ref[...],
                preferred_element_type=jnp.float32) + b1_ref[...]
    h = 0.5 * h * (1.0 + lax.erf(h * (1.0 / math.sqrt(2.0))))          # exact GELU (f32)
    f = jnp.dot(h.astype(cd), w2_ref[...],
                preferred_element_type=jnp.float32) + b2_ref[...]
    y = x + f
    mu = jnp.mean(y, axis=-1, keepdims=True)
    var = jnp.mean((y - mu) ** 2, axis=-1, keepdims=True)
    y = (y - mu) * lax.rsqrt(var + EPS)
    o_ref[...] = (y * g_ref[...] + beta_ref[...]).astype(o_ref.dtype)


def ffn_block(x, w1, b1, w2, b2, ln_g, ln_b, *, compute_dtype=jnp.float32):
    B, L, E = x.shape
    Hd = w1.shape[1]
    M = B * L
    tm = _row_tile(M, cap=512)
    x2 = x.reshape(M, E)
    const = lambda i: (0, 0)

    out = pl.pallas_call(
        _ffn_ln_kernel,
        out_shape=jax.ShapeDtypeStruct((M, E), x.dtype),
        grid=(M // tm,),
        in_specs=[
            pl.BlockSpec((tm, E), lambda i: (i, 0)),
            pl.BlockSpec((E, Hd), const),
            pl.BlockSpec((1, Hd), const),
            pl.BlockSpec((Hd, E), const),
            pl.BlockSpec((1, E), const),
            pl.BlockSpec((1, E), const),
            pl.BlockSpec((1, E), const),
        ],
        out_specs=pl.BlockSpec((tm, E), lambda i: (i, 0)),
        compiler_params=pltpu.CompilerParams(dimension_semantics=("parallel",)),
    )(x2, w1.astype(compute_dtype), b1.reshape(1, Hd),
      w2.astype(compute_dtype), b2.reshape(1, E),
      ln_g.reshape(1, E), ln_b.reshape(1, E))
    return out.reshape(B, L, E)


# ======================================================================================
# TransformerDecoderLayer forward (3 fused pallas_calls)
# ======================================================================================
def transformer_decoder_layer(params, src, tgt, src_mask=None, tgt_mask=None,
                              compute_dtype=jnp.float32):
    H = params["num_heads"]
    # 1) causal decoder self-attention (+ residual + LN1); dropout = identity (eval)
    tgt = attention_block(tgt, tgt, tgt_mask, params["dec_attn"],
                          params["ln1_g"], params["ln1_b"],
                          num_heads=H, causal=True, compute_dtype=compute_dtype)
    # 2) cross-attention with encoded source (+ residual + LN2)
    tgt = attention_block(tgt, src, src_mask, params["cross_attn"],
                          params["ln2_g"], params["ln2_b"],
                          num_heads=H, causal=False, compute_dtype=compute_dtype)
    # 3) MLP (+ residual + final LN)
    return ffn_block(tgt, params["ffn_w1"], params["ffn_b1"],
                     params["ffn_w2"], params["ffn_b2"],
                     params["ln3_g"], params["ln3_b"], compute_dtype=compute_dtype)


# ------------------------------- parameters ----------------------------------
def _init_linear(key, din, dout):
    kw, kb = jax.random.split(key)
    lim = 1.0 / math.sqrt(din)
    w = jax.random.uniform(kw, (din, dout), jnp.float32, -lim, lim)
    b = jax.random.uniform(kb, (dout,), jnp.float32, -lim, lim)
    return w, b


def init_params(key, embed_dim, num_heads, mlp_ratio):
    hidden = embed_dim * mlp_ratio
    keys = jax.random.split(key, 12)

    def attn_params(ks):
        wq, bq = _init_linear(ks[0], embed_dim, embed_dim)
        wk, bk = _init_linear(ks[1], embed_dim, embed_dim)
        wv, bv = _init_linear(ks[2], embed_dim, embed_dim)
        wo, bo = _init_linear(ks[3], embed_dim, embed_dim)
        return dict(wq=wq, bq=bq, wk=wk, bk=bk, wv=wv, bv=bv, wo=wo, bo=bo)

    ffn_w1, ffn_b1 = _init_linear(keys[8], embed_dim, hidden)
    ffn_w2, ffn_b2 = _init_linear(keys[9], hidden, embed_dim)
    return dict(
        num_heads=num_heads,
        dec_attn=attn_params(keys[0:4]),
        cross_attn=attn_params(keys[4:8]),
        ffn_w1=ffn_w1, ffn_b1=ffn_b1, ffn_w2=ffn_w2, ffn_b2=ffn_b2,
        ln1_g=jnp.ones((embed_dim,), jnp.float32), ln1_b=jnp.zeros((embed_dim,), jnp.float32),
        ln2_g=jnp.ones((embed_dim,), jnp.float32), ln2_b=jnp.zeros((embed_dim,), jnp.float32),
        ln3_g=jnp.ones((embed_dim,), jnp.float32), ln3_b=jnp.zeros((embed_dim,), jnp.float32),
    )


# ------------------------------ pure-JAX reference ----------------------------
def _ref_attention(p, src, tgt, attention_mask, causal, H):
    q_inp = src if tgt is None else tgt
    B, Lk, E = src.shape
    Lq = q_inp.shape[1]
    Dh = E // H
    q = (q_inp.reshape(B * Lq, E) @ p["wq"] + p["bq"]).reshape(B, Lq, H, Dh).transpose(0, 2, 1, 3)
    k = (src.reshape(B * Lk, E) @ p["wk"] + p["bk"]).reshape(B, Lk, H, Dh).transpose(0, 2, 1, 3)
    v = (src.reshape(B * Lk, E) @ p["wv"] + p["bv"]).reshape(B, Lk, H, Dh).transpose(0, 2, 1, 3)
    s = jnp.einsum("bhqd,bhkd->bhqk", q, k) / math.sqrt(Dh)
    if attention_mask is not None:
        s = jnp.where(attention_mask.astype(bool)[:, None, None, :], s, NEG_INF)
    if causal:
        cm = jnp.arange(Lk)[None, :] <= jnp.arange(Lq)[:, None]
        s = jnp.where(cm[None, None], s, NEG_INF)
    a = jax.nn.softmax(s, axis=-1)
    o = jnp.einsum("bhqk,bhkd->bhqd", a, v).transpose(0, 2, 1, 3).reshape(B, Lq, E)
    return (o.reshape(B * Lq, E) @ p["wo"] + p["bo"]).reshape(B, Lq, E)


def _ref_ln(x, g, b):
    mu = jnp.mean(x, axis=-1, keepdims=True)
    var = jnp.mean((x - mu) ** 2, axis=-1, keepdims=True)
    return (x - mu) * jax.lax.rsqrt(var + EPS) * g + b


def reference_forward(params, src, tgt, src_mask, tgt_mask):
    H = params["num_heads"]
    tgt = _ref_ln(tgt + _ref_attention(params["dec_attn"], tgt, None, tgt_mask, True, H),
                  params["ln1_g"], params["ln1_b"])
    tgt = _ref_ln(tgt + _ref_attention(params["cross_attn"], src, tgt, src_mask, False, H),
                  params["ln2_g"], params["ln2_b"])
    h = jax.nn.gelu(tgt @ params["ffn_w1"] + params["ffn_b1"], approximate=False)
    tgt = _ref_ln(tgt + (h @ params["ffn_w2"] + params["ffn_b2"]),
                  params["ln3_g"], params["ln3_b"])
    return tgt


# ----------------------------------- main -------------------------------------
if __name__ == "__main__":
    key = jax.random.PRNGKey(0)
    k_params, k_src, k_tgt = jax.random.split(key, 3)

    B, Ls, Lt, E, H, MLP_RATIO = 2, 8, 16, 32, 4, 4
    params = init_params(k_params, E, H, MLP_RATIO)

    src = jax.random.normal(k_src, (B, Ls, E), jnp.float32)   # encoded source (english)
    tgt = jax.random.normal(k_tgt, (B, Lt, E), jnp.float32)   # decoder input (french)

    # source padding mask (1 = attend, 0 = padding); last 2 source tokens of batch 1 padded.
    src_mask = jnp.array([[1] * Ls, [1] * (Ls - 2) + [0, 0]], dtype=jnp.int32)
    # tgt_mask=None: PyTorch SDPA forbids attn_mask together with is_causal=True,
    # so valid usage passes only causal masking for the decoder self-attention.
    tgt_mask = None

    ref = reference_forward(params, src, tgt, src_mask, tgt_mask)

    # f32 MXU path: exact parity with the PyTorch/JAX reference.
    out = transformer_decoder_layer(params, src, tgt, src_mask, tgt_mask,
                                    compute_dtype=jnp.float32)
    out = jax.block_until_ready(out)
    assert out.shape == (B, Lt, E)
    assert jnp.allclose(out, ref, atol=1e-3, rtol=1e-3), "Pallas f32 output mismatch vs reference"

    # bf16 MXU path (weights pre-cast to bf16, f32 accumulation) -- looser tolerance.
    out_bf16 = transformer_decoder_layer(params, src, tgt, src_mask, tgt_mask,
                                         compute_dtype=jnp.bfloat16)
    out_bf16 = jax.block_until_ready(out_bf16)
    assert jnp.allclose(out_bf16, ref, atol=1e-1, rtol=1e-1), "Pallas bf16 output mismatch vs reference"

    print("KERNEL_OK")
</pallas_src>

<mosaic_0001>
module attributes {stable_mosaic.version = 11 : i64} {
  func.func @_attn_block_kernel(%arg0: i32, %arg1: i32, %arg2: memref<1x16x32xf32, #tpu.memory_space<vmem>>, %arg3: memref<1x16x32xf32, #tpu.memory_space<vmem>>, %arg4: memref<1x1x16xi32, #tpu.memory_space<vmem>>, %arg5: memref<32x32xf32, #tpu.memory_space<vmem>>, %arg6: memref<1x32xf32, #tpu.memory_space<vmem>>, %arg7: memref<32x64xf32, #tpu.memory_space<vmem>>, %arg8: memref<1x64xf32, #tpu.memory_space<vmem>>, %arg9: memref<4x8x32xf32, #tpu.memory_space<vmem>>, %arg10: memref<1x32xf32, #tpu.memory_space<vmem>>, %arg11: memref<1x32xf32, #tpu.memory_space<vmem>>, %arg12: memref<1x32xf32, #tpu.memory_space<vmem>>, %arg13: memref<1x16x32xf32, #tpu.memory_space<vmem>>) attributes {dimension_semantics = [#tpu.dimension_semantics<parallel>, #tpu.dimension_semantics<parallel>], iteration_bounds = array<i64: 2, 1>, scalar_prefetch = 0 : i64, scratch_operands = 0 : i64, tpu.core_type = #tpu.core_type<tc>, window_params = [{transform_indices = @transform_0, window_bounds = array<i64: 1, 16, 32>}, {transform_indices = @transform_1, window_bounds = array<i64: 1, 16, 32>}, {transform_indices = @transform_2, window_bounds = array<i64: 1, 1, 16>}, {pipeline_mode = #tpu.pipeline_mode<synchronous>, transform_indices = @transform_3, window_bounds = array<i64: 32, 32>}, {pipeline_mode = #tpu.pipeline_mode<synchronous>, transform_indices = @transform_4, window_bounds = array<i64: 1, 32>}, {pipeline_mode = #tpu.pipeline_mode<synchronous>, transform_indices = @transform_5, window_bounds = array<i64: 32, 64>}, {pipeline_mode = #tpu.pipeline_mode<synchronous>, transform_indices = @transform_6, window_bounds = array<i64: 1, 64>}, {pipeline_mode = #tpu.pipeline_mode<synchronous>, transform_indices = @transform_7, window_bounds = array<i64: 4, 8, 32>}, {pipeline_mode = #tpu.pipeline_mode<synchronous>, transform_indices = @transform_8, window_bounds = array<i64: 1, 32>}, {pipeline_mode = #tpu.pipeline_mode<synchronous>, transform_indices = @transform_9, window_bounds = array<i64: 1, 32>}, {pipeline_mode = #tpu.pipeline_mode<synchronous>, transform_indices = @transform_10, window_bounds = array<i64: 1, 32>}, {transform_indices = @transform_11, window_bounds = array<i64: 1, 16, 32>}]} {
    %c0 = arith.constant 0 : index
    %c0_0 = arith.constant 0 : index
    %c0_1 = arith.constant 0 : index
    %0 = vector.load %arg2[%c0, %c0_0, %c0_1] : memref<1x16x32xf32, #tpu.memory_space<vmem>>, vector<1x16x32xf32>
    %1 = vector.shape_cast %0 : vector<1x16x32xf32> to vector<16x32xf32>
    %c0_2 = arith.constant 0 : index
    %c0_3 = arith.constant 0 : index
    %c0_4 = arith.constant 0 : index
    %2 = vector.load %arg3[%c0_2, %c0_3, %c0_4] : memref<1x16x32xf32, #tpu.memory_space<vmem>>, vector<1x16x32xf32>
    %3 = vector.shape_cast %2 : vector<1x16x32xf32> to vector<16x32xf32>
    %c0_5 = arith.constant 0 : index
    %c0_6 = arith.constant 0 : index
    %4 = vector.load %arg5[%c0_5, %c0_6] : memref<32x32xf32, #tpu.memory_space<vmem>>, vector<32x32xf32>
    %cst = arith.constant dense<0.000000e+00> : vector<16x32xf32>
    %5 = tpu.matmul %1, %4, %cst {dimension_numbers = #tpu.dot_dimension_numbers<[1], [0], [0], [1], [0, 0, 1, 1], [], []>} : vector<16x32xf32>, vector<32x32xf32>, vector<16x32xf32> -> vector<16x32xf32>
    %c0_7 = arith.constant 0 : index
    %c0_8 = arith.constant 0 : index
    %6 = vector.load %arg6[%c0_7, %c0_8] : memref<1x32xf32, #tpu.memory_space<vmem>>, vector<1x32xf32>
    %7 = vector.broadcast %6 : vector<1x32xf32> to vector<16x32xf32>
    %8 = arith.addf %5, %7 : vector<16x32xf32>
    %c0_9 = arith.constant 0 : index
    %c0_10 = arith.constant 0 : index
    %9 = vector.load %arg7[%c0_9, %c0_10] : memref<32x64xf32, #tpu.memory_space<vmem>>, vector<32x64xf32>
    %cst_11 = arith.constant dense<0.000000e+00> : vector<16x64xf32>
    %10 = tpu.matmul %3, %9, %cst_11 {dimension_numbers = #tpu.dot_dimension_numbers<[1], [0], [0], [1], [0, 0, 1, 1], [], []>} : vector<16x32xf32>, vector<32x64xf32>, vector<16x64xf32> -> vector<16x64xf32>
    %c0_12 = arith.constant 0 : index
    %c0_13 = arith.constant 0 : index
    %11 = vector.load %arg8[%c0_12, %c0_13] : memref<1x64xf32, #tpu.memory_space<vmem>>, vector<1x64xf32>
    %12 = vector.broadcast %11 : vector<1x64xf32> to vector<16x64xf32>
    %13 = arith.addf %10, %12 : vector<16x64xf32>
    %14 = vector.extract_strided_slice %13 {offsets = [0, 0], sizes = [16, 32], strides = [1, 1]} : vector<16x64xf32> to vector<16x32xf32>
    %15 = vector.extract_strided_slice %13 {offsets = [0, 32], sizes = [16, 32], strides = [1, 1]} : vector<16x64xf32> to vector<16x32xf32>
    %c0_14 = arith.constant 0 : index
    %c0_15 = arith.constant 0 : index
    %c0_16 = arith.constant 0 : index
    %16 = vector.load %arg4[%c0_14, %c0_15, %c0_16] : memref<1x1x16xi32, #tpu.memory_space<vmem>>, vector<1x1x16xi32>
    %17 = vector.shape_cast %16 : vector<1x1x16xi32> to vector<1x16xi32>
    %c0_i32 = arith.constant 0 : i32
    %18 = vector.broadcast %c0_i32 : i32 to vector<1x16xi32>
    %19 = arith.cmpi sgt, %17, %18 : vector<1x16xi32>
    %cst_17 = arith.constant 0.000000e+00 : f32
    %cst_18 = arith.constant -1.000000e+30 : f32
    %20 = vector.broadcast %cst_17 : f32 to vector<1x16xf32>
    %21 = vector.broadcast %cst_18 : f32 to vector<1x16xf32>
    %22 = arith.select %19, %20, %21 : vector<1x16xi1>, vector<1x16xf32>
    %c16_i32 = arith.constant 16 : i32
    %23 = arith.muli %arg1, %c16_i32 : i32
    %24 = tpu.iota {dimensions = array<i32: 0>} : vector<16x16xi32>
    %25 = vector.broadcast %23 : i32 to vector<16x16xi32>
    %26 = arith.addi %25, %24 : vector<16x16xi32>
    %27 = tpu.iota {dimensions = array<i32: 1>} : vector<16x16xi32>
    %28 = arith.cmpi sle, %27, %26 : vector<16x16xi32>
    %cst_19 = arith.constant 0.000000e+00 : f32
    %cst_20 = arith.constant -1.000000e+30 : f32
    %29 = vector.broadcast %cst_19 : f32 to vector<16x16xf32>
    %30 = vector.broadcast %cst_20 : f32 to vector<16x16xf32>
    %31 = arith.select %28, %29, %30 : vector<16x16xi1>, vector<16x16xf32>
    %32 = vector.broadcast %22 : vector<1x16xf32> to vector<16x16xf32>
    %33 = arith.addf %32, %31 : vector<16x16xf32>
    %cst_21 = arith.constant 0.000000e+00 : f32
    %34 = vector.broadcast %cst_21 : f32 to vector<16x32xf32>
    %35 = vector.extract_strided_slice %8 {offsets = [0, 0], sizes = [16, 8], strides = [1, 1]} : vector<16x32xf32> to vector<16x8xf32>
    %36 = vector.extract_strided_slice %14 {offsets = [0, 0], sizes = [16, 8], strides = [1, 1]} : vector<16x32xf32> to vector<16x8xf32>
    %37 = vector.extract_strided_slice %15 {offsets = [0, 0], sizes = [16, 8], strides = [1, 1]} : vector<16x32xf32> to vector<16x8xf32>
    %cst_22 = arith.constant dense<0.000000e+00> : vector<16x16xf32>
    %38 = tpu.matmul %35, %36, %cst_22 {dimension_numbers = #tpu.dot_dimension_numbers<[1], [1], [0], [0], [0, 0, 1, 0], [], []>} : vector<16x8xf32>, vector<16x8xf32>, vector<16x16xf32> -> vector<16x16xf32>
    %cst_23 = arith.constant 0.353553385 : f32
    %39 = vector.broadcast %cst_23 : f32 to vector<16x16xf32>
    %40 = arith.mulf %38, %39 : vector<16x16xf32>
    %41 = arith.addf %40, %33 : vector<16x16xf32>
    %cst_24 = arith.constant dense<0xFF800000> : vector<16xf32>
    %42 = vector.multi_reduction <maximumf>, %41, %cst_24 [1] : vector<16x16xf32> to vector<16xf32>
    %43 = vector.shape_cast %42 : vector<16xf32> to vector<16x1xf32>
    %44 = vector.broadcast %43 : vector<16x1xf32> to vector<16x16xf32>
    %45 = arith.subf %41, %44 : vector<16x16xf32>
    %46 = math.exp %45 : vector<16x16xf32>
    %cst_25 = arith.constant dense<0.000000e+00> : vector<16xf32>
    %47 = vector.multi_reduction <add>, %46, %cst_25 [1] : vector<16x16xf32> to vector<16xf32>
    %48 = vector.shape_cast %47 : vector<16xf32> to vector<16x1xf32>
    %49 = tpu.reciprocal %48 : vector<16x1xf32> -> vector<16x1xf32>
    %cst_26 = arith.constant dense<0.000000e+00> : vector<16x8xf32>
    %50 = tpu.matmul %46, %37, %cst_26 {dimension_numbers = #tpu.dot_dimension_numbers<[1], [0], [0], [1], [0, 0, 1, 1], [], []>} : vector<16x16xf32>, vector<16x8xf32>, vector<16x8xf32> -> vector<16x8xf32>
    %51 = vector.broadcast %49 : vector<16x1xf32> to vector<16x8xf32>
    %52 = arith.mulf %50, %51 : vector<16x8xf32>
    %c0_27 = arith.constant 0 : index
    %c0_28 = arith.constant 0 : index
    %c0_29 = arith.constant 0 : index
    %53 = vector.load %arg9[%c0_27, %c0_28, %c0_29] : memref<4x8x32xf32, #tpu.memory_space<vmem>>, vector<1x8x32xf32>
    %54 = vector.shape_cast %53 : vector<1x8x32xf32> to vector<8x32xf32>
    %cst_30 = arith.constant dense<0.000000e+00> : vector<16x32xf32>
    %55 = tpu.matmul %52, %54, %cst_30 {dimension_numbers = #tpu.dot_dimension_numbers<[1], [0], [0], [1], [0, 0, 1, 1], [], []>} : vector<16x8xf32>, vector<8x32xf32>, vector<16x32xf32> -> vector<16x32xf32>
    %56 = arith.addf %34, %55 : vector<16x32xf32>
    %57 = vector.extract_strided_slice %8 {offsets = [0, 8], sizes = [16, 8], strides = [1, 1]} : vector<16x32xf32> to vector<16x8xf32>
    %58 = vector.extract_strided_slice %14 {offsets = [0, 8], sizes = [16, 8], strides = [1, 1]} : vector<16x32xf32> to vector<16x8xf32>
    %59 = vector.extract_strided_slice %15 {offsets = [0, 8], sizes = [16, 8], strides = [1, 1]} : vector<16x32xf32> to vector<16x8xf32>
    %cst_31 = arith.constant dense<0.000000e+00> : vector<16x16xf32>
    %60 = tpu.matmul %57, %58, %cst_31 {dimension_numbers = #tpu.dot_dimension_numbers<[1], [1], [0], [0], [0, 0, 1, 0], [], []>} : vector<16x8xf32>, vector<16x8xf32>, vector<16x16xf32> -> vector<16x16xf32>
    %cst_32 = arith.constant 0.353553385 : f32
    %61 = vector.broadcast %cst_32 : f32 to vector<16x16xf32>
    %62 = arith.mulf %60, %61 : vector<16x16xf32>
    %63 = arith.addf %62, %33 : vector<16x16xf32>
    %cst_33 = arith.constant dense<0xFF800000> : vector<16xf32>
    %64 = vector.multi_reduction <maximumf>, %63, %cst_33 [1] : vector<16x16xf32> to vector<16xf32>
    %65 = vector.shape_cast %64 : vector<16xf32> to vector<16x1xf32>
    %66 = vector.broadcast %65 : vector<16x1xf32> to vector<16x16xf32>
    %67 = arith.subf %63, %66 : vector<16x16xf32>
    %68 = math.exp %67 : vector<16x16xf32>
    %cst_34 = arith.constant dense<0.000000e+00> : vector<16xf32>
    %69 = vector.multi_reduction <add>, %68, %cst_34 [1] : vector<16x16xf32> to vector<16xf32>
    %70 = vector.shape_cast %69 : vector<16xf32> to vector<16x1xf32>
    %71 = tpu.reciprocal %70 : vector<16x1xf32> -> vector<16x1xf32>
    %cst_35 = arith.constant dense<0.000000e+00> : vector<16x8xf32>
    %72 = tpu.matmul %68, %59, %cst_35 {dimension_numbers = #tpu.dot_dimension_numbers<[1], [0], [0], [1], [0, 0, 1, 1], [], []>} : vector<16x16xf32>, vector<16x8xf32>, vector<16x8xf32> -> vector<16x8xf32>
    %73 = vector.broadcast %71 : vector<16x1xf32> to vector<16x8xf32>
    %74 = arith.mulf %72, %73 : vector<16x8xf32>
    %c1 = arith.constant 1 : index
    %c0_36 = arith.constant 0 : index
    %c0_37 = arith.constant 0 : index
    %75 = vector.load %arg9[%c1, %c0_36, %c0_37] : memref<4x8x32xf32, #tpu.memory_space<vmem>>, vector<1x8x32xf32>
    %76 = vector.shape_cast %75 : vector<1x8x32xf32> to vector<8x32xf32>
    %cst_38 = arith.constant dense<0.000000e+00> : vector<16x32xf32>
    %77 = tpu.matmul %74, %76, %cst_38 {dimension_numbers = #tpu.dot_dimension_numbers<[1], [0], [0], [1], [0, 0, 1, 1], [], []>} : vector<16x8xf32>, vector<8x32xf32>, vector<16x32xf32> -> vector<16x32xf32>
    %78 = arith.addf %56, %77 : vector<16x32xf32>
    %79 = vector.extract_strided_slice %8 {offsets = [0, 16], sizes = [16, 8], strides = [1, 1]} : vector<16x32xf32> to vector<16x8xf32>
    %80 = vector.extract_strided_slice %14 {offsets = [0, 16], sizes = [16, 8], strides = [1, 1]} : vector<16x32xf32> to vector<16x8xf32>
    %81 = vector.extract_strided_slice %15 {offsets = [0, 16], sizes = [16, 8], strides = [1, 1]} : vector<16x32xf32> to vector<16x8xf32>
    %cst_39 = arith.constant dense<0.000000e+00> : vector<16x16xf32>
    %82 = tpu.matmul %79, %80, %cst_39 {dimension_numbers = #tpu.dot_dimension_numbers<[1], [1], [0], [0], [0, 0, 1, 0], [], []>} : vector<16x8xf32>, vector<16x8xf32>, vector<16x16xf32> -> vector<16x16xf32>
    %cst_40 = arith.constant 0.353553385 : f32
    %83 = vector.broadcast %cst_40 : f32 to vector<16x16xf32>
    %84 = arith.mulf %82, %83 : vector<16x16xf32>
    %85 = arith.addf %84, %33 : vector<16x16xf32>
    %cst_41 = arith.constant dense<0xFF800000> : vector<16xf32>
    %86 = vector.multi_reduction <maximumf>, %85, %cst_41 [1] : vector<16x16xf32> to vector<16xf32>
    %87 = vector.shape_cast %86 : vector<16xf32> to vector<16x1xf32>
    %88 = vector.broadcast %87 : vector<16x1xf32> to vector<16x16xf32>
    %89 = arith.subf %85, %88 : vector<16x16xf32>
    %90 = math.exp %89 : vector<16x16xf32>
    %cst_42 = arith.constant dense<0.000000e+00> : vector<16xf32>
    %91 = vector.multi_reduction <add>, %90, %cst_42 [1] : vector<16x16xf32> to vector<16xf32>
    %92 = vector.shape_cast %91 : vector<16xf32> to vector<16x1xf32>
    %93 = tpu.reciprocal %92 : vector<16x1xf32> -> vector<16x1xf32>
    %cst_43 = arith.constant dense<0.000000e+00> : vector<16x8xf32>
    %94 = tpu.matmul %90, %81, %cst_43 {dimension_numbers = #tpu.dot_dimension_numbers<[1], [0], [0], [1], [0, 0, 1, 1], [], []>} : vector<16x16xf32>, vector<16x8xf32>, vector<16x8xf32> -> vector<16x8xf32>
    %95 = vector.broadcast %93 : vector<16x1xf32> to vector<16x8xf32>
    %96 = arith.mulf %94, %95 : vector<16x8xf32>
    %c2 = arith.constant 2 : index
    %c0_44 = arith.constant 0 : index
    %c0_45 = arith.constant 0 : index
    %97 = vector.load %arg9[%c2, %c0_44, %c0_45] : memref<4x8x32xf32, #tpu.memory_space<vmem>>, vector<1x8x32xf32>
    %98 = vector.shape_cast %97 : vector<1x8x32xf32> to vector<8x32xf32>
    %cst_46 = arith.constant dense<0.000000e+00> : vector<16x32xf32>
    %99 = tpu.matmul %96, %98, %cst_46 {dimension_numbers = #tpu.dot_dimension_numbers<[1], [0], [0], [1], [0, 0, 1, 1], [], []>} : vector<16x8xf32>, vector<8x32xf32>, vector<16x32xf32> -> vector<16x32xf32>
    %100 = arith.addf %78, %99 : vector<16x32xf32>
    %101 = vector.extract_strided_slice %8 {offsets = [0, 24], sizes = [16, 8], strides = [1, 1]} : vector<16x32xf32> to vector<16x8xf32>
    %102 = vector.extract_strided_slice %14 {offsets = [0, 24], sizes = [16, 8], strides = [1, 1]} : vector<16x32xf32> to vector<16x8xf32>
    %103 = vector.extract_strided_slice %15 {offsets = [0, 24], sizes = [16, 8], strides = [1, 1]} : vector<16x32xf32> to vector<16x8xf32>
    %cst_47 = arith.constant dense<0.000000e+00> : vector<16x16xf32>
    %104 = tpu.matmul %101, %102, %cst_47 {dimension_numbers = #tpu.dot_dimension_numbers<[1], [1], [0], [0], [0, 0, 1, 0], [], []>} : vector<16x8xf32>, vector<16x8xf32>, vector<16x16xf32> -> vector<16x16xf32>
    %cst_48 = arith.constant 0.353553385 : f32
    %105 = vector.broadcast %cst_48 : f32 to vector<16x16xf32>
    %106 = arith.mulf %104, %105 : vector<16x16xf32>
    %107 = arith.addf %106, %33 : vector<16x16xf32>
    %cst_49 = arith.constant dense<0xFF800000> : vector<16xf32>
    %108 = vector.multi_reduction <maximumf>, %107, %cst_49 [1] : vector<16x16xf32> to vector<16xf32>
    %109 = vector.shape_cast %108 : vector<16xf32> to vector<16x1xf32>
    %110 = vector.broadcast %109 : vector<16x1xf32> to vector<16x16xf32>
    %111 = arith.subf %107, %110 : vector<16x16xf32>
    %112 = math.exp %111 : vector<16x16xf32>
    %cst_50 = arith.constant dense<0.000000e+00> : vector<16xf32>
    %113 = vector.multi_reduction <add>, %112, %cst_50 [1] : vector<16x16xf32> to vector<16xf32>
    %114 = vector.shape_cast %113 : vector<16xf32> to vector<16x1xf32>
    %115 = tpu.reciprocal %114 : vector<16x1xf32> -> vector<16x1xf32>
    %cst_51 = arith.constant dense<0.000000e+00> : vector<16x8xf32>
    %116 = tpu.matmul %112, %103, %cst_51 {dimension_numbers = #tpu.dot_dimension_numbers<[1], [0], [0], [1], [0, 0, 1, 1], [], []>} : vector<16x16xf32>, vector<16x8xf32>, vector<16x8xf32> -> vector<16x8xf32>
    %117 = vector.broadcast %115 : vector<16x1xf32> to vector<16x8xf32>
    %118 = arith.mulf %116, %117 : vector<16x8xf32>
    %c3 = arith.constant 3 : index
    %c0_52 = arith.constant 0 : index
    %c0_53 = arith.constant 0 : index
    %119 = vector.load %arg9[%c3, %c0_52, %c0_53] : memref<4x8x32xf32, #tpu.memory_space<vmem>>, vector<1x8x32xf32>
    %120 = vector.shape_cast %119 : vector<1x8x32xf32> to vector<8x32xf32>
    %cst_54 = arith.constant dense<0.000000e+00> : vector<16x32xf32>
    %121 = tpu.matmul %118, %120, %cst_54 {dimension_numbers = #tpu.dot_dimension_numbers<[1], [0], [0], [1], [0, 0, 1, 1], [], []>} : vector<16x8xf32>, vector<8x32xf32>, vector<16x32xf32> -> vector<16x32xf32>
    %122 = arith.addf %100, %121 : vector<16x32xf32>
    %c0_55 = arith.constant 0 : index
    %c0_56 = arith.constant 0 : index
    %123 = vector.load %arg10[%c0_55, %c0_56] : memref<1x32xf32, #tpu.memory_space<vmem>>, vector<1x32xf32>
    %124 = vector.broadcast %123 : vector<1x32xf32> to vector<16x32xf32>
    %125 = arith.addf %122, %124 : vector<16x32xf32>
    %126 = arith.addf %1, %125 : vector<16x32xf32>
    %cst_57 = arith.constant dense<0.000000e+00> : vector<16xf32>
    %127 = vector.multi_reduction <add>, %126, %cst_57 [1] : vector<16x32xf32> to vector<16xf32>
    %128 = vector.shape_cast %127 : vector<16xf32> to vector<16x1xf32>
    %cst_58 = arith.constant 3.200000e+01 : f32
    %129 = vector.broadcast %cst_58 : f32 to vector<16x1xf32>
    %130 = arith.divf %128, %129 : vector<16x1xf32>
    %131 = vector.broadcast %130 : vector<16x1xf32> to vector<16x32xf32>
    %132 = arith.subf %126, %131 : vector<16x32xf32>
    %133 = arith.mulf %132, %132 : vector<16x32xf32>
    %cst_59 = arith.constant dense<0.000000e+00> : vector<16xf32>
    %134 = vector.multi_reduction <add>, %133, %cst_59 [1] : vector<16x32xf32> to vector<16xf32>
    %135 = vector.shape_cast %134 : vector<16xf32> to vector<16x1xf32>
    %cst_60 = arith.constant 3.200000e+01 : f32
    %136 = vector.broadcast %cst_60 : f32 to vector<16x1xf32>
    %137 = arith.divf %135, %136 : vector<16x1xf32>
    %138 = vector.broadcast %130 : vector<16x1xf32> to vector<16x32xf32>
    %139 = arith.subf %126, %138 : vector<16x32xf32>
    %cst_61 = arith.constant 9.99999974E-6 : f32
    %140 = vector.broadcast %cst_61 : f32 to vector<16x1xf32>
    %141 = arith.addf %137, %140 : vector<16x1xf32>
    %142 = math.rsqrt %141 : vector<16x1xf32>
    %143 = vector.broadcast %142 : vector<16x1xf32> to vector<16x32xf32>
    %144 = arith.mulf %139, %143 : vector<16x32xf32>
    %c0_62 = arith.constant 0 : index
    %c0_63 = arith.constant 0 : index
    %145 = vector.load %arg11[%c0_62, %c0_63] : memref<1x32xf32, #tpu.memory_space<vmem>>, vector<1x32xf32>
    %146 = vector.broadcast %145 : vector<1x32xf32> to vector<16x32xf32>
    %147 = arith.mulf %144, %146 : vector<16x32xf32>
    %c0_64 = arith.constant 0 : index
    %c0_65 = arith.constant 0 : index
    %148 = vector.load %arg12[%c0_64, %c0_65] : memref<1x32xf32, #tpu.memory_space<vmem>>, vector<1x32xf32>
    %149 = vector.broadcast %148 : vector<1x32xf32> to vector<16x32xf32>
    %150 = arith.addf %147, %149 : vector<16x32xf32>
    %c0_66 = arith.constant 0 : index
    %c0_67 = arith.constant 0 : index
    %c0_68 = arith.constant 0 : index
    %151 = vector.load %arg13[%c0_66, %c0_67, %c0_68] : memref<1x16x32xf32, #tpu.memory_space<vmem>>, vector<1x16x32xf32>
    %152 = vector.shape_cast %151 : vector<1x16x32xf32> to vector<16x32xf32>
    %153 = vector.shape_cast %150 : vector<16x32xf32> to vector<1x16x32xf32>
    tpu.vector_store %arg13[%c0_66, %c0_67, %c0_68], %153 {strides = array<i32>} : memref<1x16x32xf32, #tpu.memory_space<vmem>>, vector<1x16x32xf32>,
    return
  }
  func.func @transform_0(%arg0: i32, %arg1: i32) -> (i32, i32, i32) {
    %c0_i32 = arith.constant 0 : i32
    %c0_i32_0 = arith.constant 0 : i32
    return %arg0, %arg1, %c0_i32 : i32, i32, i32
  }
  func.func @transform_1(%arg0: i32, %arg1: i32) -> (i32, i32, i32) {
    %c0_i32 = arith.constant 0 : i32
    %c0_i32_0 = arith.constant 0 : i32
    %c0_i32_1 = arith.constant 0 : i32
    return %arg0, %c0_i32, %c0_i32_0 : i32, i32, i32
  }
  func.func @transform_2(%arg0: i32, %arg1: i32) -> (i32, i32, i32) {
    %c0_i32 = arith.constant 0 : i32
    %c0_i32_0 = arith.constant 0 : i32
    %c0_i32_1 = arith.constant 0 : i32
    return %arg0, %c0_i32, %c0_i32_0 : i32, i32, i32
  }
  func.func @transform_3(%arg0: i32, %arg1: i32) -> (i32, i32) {
    %c0_i32 = arith.constant 0 : i32
    %c0_i32_0 = arith.constant 0 : i32
    %c0_i32_1 = arith.constant 0 : i32
    return %c0_i32, %c0_i32_0 : i32, i32
  }
  func.func @transform_4(%arg0: i32, %arg1: i32) -> (i32, i32) {
    %c0_i32 = arith.constant 0 : i32
    %c0_i32_0 = arith.constant 0 : i32
    %c0_i32_1 = arith.constant 0 : i32
    return %c0_i32, %c0_i32_0 : i32, i32
  }
  func.func @transform_5(%arg0: i32, %arg1: i32) -> (i32, i32) {
    %c0_i32 = arith.constant 0 : i32
    %c0_i32_0 = arith.constant 0 : i32
    %c0_i32_1 = arith.constant 0 : i32
    return %c0_i32, %c0_i32_0 : i32, i32
  }
  func.func @transform_6(%arg0: i32, %arg1: i32) -> (i32, i32) {
    %c0_i32 = arith.constant 0 : i32
    %c0_i32_0 = arith.constant 0 : i32
    %c0_i32_1 = arith.constant 0 : i32
    return %c0_i32, %c0_i32_0 : i32, i32
  }
  func.func @transform_7(%arg0: i32, %arg1: i32) -> (i32, i32, i32) {
    %c0_i32 = arith.constant 0 : i32
    %c0_i32_0 = arith.constant 0 : i32
    %c0_i32_1 = arith.constant 0 : i32
    %c0_i32_2 = arith.constant 0 : i32
    return %c0_i32, %c0_i32_0, %c0_i32_1 : i32, i32, i32
  }
  func.func @transform_8(%arg0: i32, %arg1: i32) -> (i32, i32) {
    %c0_i32 = arith.constant 0 : i32
    %c0_i32_0 = arith.constant 0 : i32
    %c0_i32_1 = arith.constant 0 : i32
    return %c0_i32, %c0_i32_0 : i32, i32
  }
  func.func @transform_9(%arg0: i32, %arg1: i32) -> (i32, i32) {
    %c0_i32 = arith.constant 0 : i32
    %c0_i32_0 = arith.constant 0 : i32
    %c0_i32_1 = arith.constant 0 : i32
    return %c0_i32, %c0_i32_0 : i32, i32
  }
  func.func @transform_10(%arg0: i32, %arg1: i32) -> (i32, i32) {
    %c0_i32 = arith.constant 0 : i32
    %c0_i32_0 = arith.constant 0 : i32
    %c0_i32_1 = arith.constant 0 : i32
    return %c0_i32, %c0_i32_0 : i32, i32
  }
  func.func @transform_11(%arg0: i32, %arg1: i32) -> (i32, i32, i32) {
    %c0_i32 = arith.constant 0 : i32
    %c0_i32_0 = arith.constant 0 : i32
    return %arg0, %arg1, %c0_i32 : i32, i32, i32
  }
}

</mosaic_0001>

<bundles_post_ra>
// kernel: tpu_custom_call.1
= control target key start
LH: loop header
LB: loop body
LE: loop exit
PB: predicated region body
PF: predicated region fallthrough
CT: control target
= control target key end

     0   :  { %s2480_s0 = inlined_call_operand.hbm [shape: f32[2,16,32], index: 0, kind: input, shape index: {}]   ;;  %s2481_s1 = inlined_call_operand.hbm [shape: f32[2,16,32], index: 1, kind: input, shape index: {}]   ;;  %s2482_s2 = inlined_call_operand.hbm [shape: s32[2,1,16], index: 2, kind: input, shape index: {}]   ;;  %s2483_s3 = inlined_call_operand.hbm [shape: f32[32,32], index: 3, kind: input, shape index: {}]   ;;  %s2484_s4 = inlined_call_operand.vmem [shape: f32[1,32], index: 4, kind: input, shape index: {}]   ;;  %s2485_s5 = inlined_call_operand.hbm [shape: f32[32,64], index: 5, kind: input, shape index: {}]   ;;  %s2486_s6 = inlined_call_operand.vmem [shape: f32[1,64], index: 6, kind: input, shape index: {}]   ;;  %s2487_s7 = inlined_call_operand.hbm [shape: f32[4,8,32], index: 7, kind: input, shape index: {}]   ;;  %s2488_s8 = inlined_call_operand.vmem [shape: f32[1,32], index: 8, kind: input, shape index: {}]   ;;  %s2489_s9 = inlined_call_operand.vmem [shape: f32[1,32], index: 9, kind: input, shape index: {}]   ;;  %s2490_s10 = inlined_call_operand.vmem [shape: f32[1,32], index: 10, kind: input, shape index: {}]   ;;  %s2491_s11 = inlined_call_operand.hbm [shape: f32[2,16,32], index: 11, kind: output, shape index: {}]  }
   0x1   :  { %2505 = sst [smem:[#allocation27_spill]] %s2481_s1 }
   0x2   :  { %2506 = sst [smem:[#allocation28_spill]] %s2483_s3 }
   0x3   :  { %2507 = sst [smem:[#allocation29_spill]] %s2485_s5 }
   0x4   :  { %2508 = sst [smem:[#allocation30_spill]] %s2489_s9 }
   0x5   :  { %2509 = sst [smem:[#allocation31_spill]] %s2490_s10 }
   0x6   :  { %2510 = sst [smem:[#allocation32_spill]] %s2491_s11 }
   0x7   :  { %16 = vsyncpa [#allocation3], 0 }
   0x8   :  { %18 = vsyncpa [#allocation3 + $0x1], 0 }
   0x9   :  { %19 = vsyncpa [#allocation6], 0 }
   0xa   :  { %21 = vsyncpa [#allocation6 + $0x1], 0 }
   0xb   :  { %22 = vsyncpa [#allocation9], 0 }
   0xc   :  { %23 = vsyncpa [#allocation12], 0 }
   0xd   :  { %24 = vsyncpa [#allocation4], 0 }
   0xe   :  { %26 = vsyncpa [#allocation4 + $0x1], 0  ;;  %s2127_s17 = smov 0   ;;  %s2129_s18 = smov 0  }
   0xf   :  { %s2131_s19 = smov 0   ;;  %s2133_s20 = smov 0  }
  0x10   :  { %s2135_s21 = smov 0   ;;  %s2137_s22 = smov 0  }
  0x11 LB: > { %2511 = sst [smem:[#allocation19_spill]] %s2029_s17  ;;  %s2158_s23 = sadd.s32 4294967295, %s2049_s22   ;;  %s2049_s22 = sphi %s2137_s22, %s32_s22   ;;  %s2045_s21 = sphi %s2135_s21, %s2547_s21   ;;  %s2041_s20 = sphi %s2133_s20, %s2546_s20   ;;  %s2037_s19 = sphi %s2131_s19, %s2542_s19   ;;  %s2033_s18 = sphi %s2129_s18, %s2545_s18   ;;  %s2029_s17 = sphi %s2127_s17, %s2544_s17  }
  0x12   : > { %2512 = sst [smem:[#allocation20_spill]] %s2037_s19  ;;  %s1527_s24 = sadd.s32 4294967294, %s2049_s22  }
  0x13   : > { %2513 = sst [smem:[#allocation21_spill]] %s2041_s20  ;;  %p66_p0 = scmp.ne.s32.totalorder %s2033_s18, %s2029_s17 }
  0x14   : > { %2514 = sst [smem:[#allocation22_spill]] %s2049_s22  ;;  %p67_p1 = scmp.eq.s32.totalorder %s2158_s23, 0 }
  0x15   : > { %p312_p2 = scmp.eq.s32.totalorder %s2158_s23, 1  ;;  %p318_p3 = scmp.eq.s32.totalorder %s1527_s24, 1 }
  0x16   : > { %p2167_p4 = por %p67_p1, %p66_p0  ;;  %p1528_p5 = scmp.ge.s32.totalorder %s2049_s22, 1 }
  0x17   : > { %p2172_p6 = por %p318_p3, %p66_p0  ;;  %p325_p7 = scmp.lt.s32.totalorder %s2049_s22, 3 }
  0x18   : > { %s2518_s3 = sld [smem:[#allocation28_spill]]  ;;  %s2051_s12 = smov [#allocation8]  }
  0x19   : > { %s2516_s26 = scalar_select %p2172_p6, 1, 0 }
  0x1a   : > { %p2180_p8 = pnand %p1528_p5, %p325_p7  ;;  %s338_s13 = sshll.u32 %s2051_s12, 4  ;;  %s339_s13 = int_to_ptr.vmem [resolvable:$true] %s338_s13 }
  0x1b   : > { %2517 = sst [smem:[#allocation23_spill]] %s2516_s26  ;;  %s2492_s15 = smov 128  }
  0x1c   : > { %p1616_p9 = pneg %p2180_p8  ;;  %s2494_s16 = smov 8  }
  0x1d   : > { %s44_s24 = sadd.s32 1, %s2045_s21  ;;  %s53_s27 = sadd.s32 1, %s2037_s19 }
  0x1e   : > { %s336_s29 = sshll.u32 %s2518_s3, 4  ;;  %p2188_p10 = pnand %p1616_p9, %p67_p1  ;;  %s337_s29 = int_to_ptr.hbm [resolvable:$true] %s336_s29 }
  0x1f   : > { %p46_p12 = scmp.ge.s32.totalorder %s44_s24, 2  ;;  %p60_p13 = scmp.ne.s32.totalorder %s2037_s19, %s2033_s18 }
  0x20   : > { %1619 = dma.hbm_to_vmem [thread:$0]  (!%p2188_p10), %s337_s29, 512, %s339_s13, [#allocation9], %s2492_s15, %s2492_s15, %s2494_s16  }
  0x21   : > { %p61_p0 = scmp.eq.s32.totalorder %s2049_s22, 0  ;;  %s2549_s24 = smov (%p46_p12, %s44_s24), 0 }
  0x22   : > { %2521 = sst [smem:[#allocation24_spill]] %s2549_s24  ;;  %p2207_p5 = por %p312_p2, %p60_p13 }
  0x23   : > { %p62_p3 = por %p61_p0, %p60_p13  ;;  %s48_s12 = ssub.s32 %s2045_s21, %s2549_s24 }
  0x24   : > { %s2522_s28 = scalar_select %p2207_p5, 1, 0 }
  0x25   : > { %p1643_p7 = scmp.lt.s32.totalorder %s2049_s22, 2  ;;  %p51_p9 = scmp.eq.s32.totalorder %s48_s12, 0 }
  0x26   : > { %2523 = sst [smem:[#allocation25_spill]] %s2522_s28  ;;  %s2215_s3 = sand.u32 1, %s2037_s19  }
  0x27   : > { %s1533_s29 = sshll.u32 %s2215_s3, 4  ;;  %s1587_s13 = sshll.u32 %s2045_s21, 4 }
  0x28   : > { %s2220_s15 = scalar_select %p51_p9, %s2037_s19, %s53_s27  }
  0x29   : > { %p2222_p11 = pnand %p1643_p7, %p62_p3  ;;  %s419_s26 = sand.u32 1, %s2049_s22  }
  0x2a   : > { %2524 = sst [smem:[#allocation26_spill]] %s2220_s15  ;;  %s423_s12 = scalar_lea.vmem [#allocation5], %s1533_s29 }
  0x2b   : > { %s2526_s1 = sld [smem:[#allocation27_spill]]  ;;  %s431_s10 = sshll.u32 %s423_s12, 4  ;;  %s432_s10 = int_to_ptr.vmem [resolvable:$true] %s431_s10 }
  0x2c   : > { %s2230_s9 = scalar_lea.sflag [#allocation6], %s419_s26  ;;  %s2527_s27 = smov 8  }
  0x2d   : > { %s2528_s15 = smov 128   ;;  %s2529_s5 = sld [smem:[#allocation29_spill]] }
  0x2e   : > { %s2054_s11 = smov [#allocation10]   ;;  %s370_s26 = sshll.u32 %s2487_s7, 4  ;;  %s371_s26 = int_to_ptr.hbm [resolvable:$true] %s370_s26 }
  0x2f   : > { %s355_s17 = sshll.u32 %s2054_s11, 4  ;;  %s406_s11 = scalar_lea.hbm %s2480_s0, %s1587_s13  ;;  %s356_s17 = int_to_ptr.vmem [resolvable:$true] %s355_s17 }
  0x31   : > { %s428_s24 = scalar_lea.hbm %s2526_s1, %s1587_s13  ;;  %s407_s1 = sshll.u32 %s406_s11, 4  ;;  %s408_s1 = int_to_ptr.hbm [resolvable:$true] %s407_s1 }
  0x32   : > { %s429_s28 = sshll.u32 %s428_s24, 4  ;;  %s399_s24 = scalar_lea.vmem [#allocation2], %s1533_s29  ;;  %s430_s28 = int_to_ptr.hbm [resolvable:$true] %s429_s28 }
  0x33   : > { %1632 = dma.hbm_to_vmem [thread:$0]  (!%p2222_p11), %s430_s28, 256, %s432_s10, %s2230_s9, %s2528_s15, %s2528_s15, %s2527_s27  }
  0x34   : > { %s353_s20 = sshll.u32 %s2529_s5, 4  ;;  %s2055_s10 = smov [#allocation11]   ;;  %s354_s20 = int_to_ptr.hbm [resolvable:$true] %s353_s20 }
  0x35   : > { %1622 = dma.hbm_to_vmem [thread:$0]  (!%p2188_p10), %s354_s20, 512, %s356_s17, [#allocation9], %s2528_s15, %s2528_s15, %s2527_s27  }
  0x36   : > { %s372_s19 = sshll.u32 %s2055_s10, 4  ;;  %s409_s12 = sshll.u32 %s399_s24, 4  ;;  %s373_s19 = int_to_ptr.vmem [resolvable:$true] %s372_s19  ;;  %s410_s12 = int_to_ptr.vmem [resolvable:$true] %s409_s12 }
  0x37   : > { %1625 = dma.hbm_to_vmem [thread:$0]  (!%p2188_p10), %s371_s26, 512, %s373_s19, [#allocation12], %s2528_s15, %s2528_s15, %s2527_s27  }
  0x38   : > { %s396_s20 = scalar_lea.sflag [#allocation3], %s2215_s3  ;;  %s447_s10 = scalar_lea.hbm %s2482_s2, %s2045_s21 }
  0x39   : > { %1629 = dma.hbm_to_vmem [thread:$0]  (!%p2222_p11), %s408_s1, 256, %s410_s12, %s396_s20, %s2528_s15, %s2528_s15, %s2527_s27  }
  0x3a   : > { %s444_s26 = scalar_lea.vmem [#allocation7], %s2215_s3  ;;  %s449_s5 = sshll.u32 %s447_s10, 4  ;;  %s450_s5 = int_to_ptr.hbm [resolvable:$true] %s449_s5 }
  0x3b   : > { %s451_s19 = sshll.u32 %s444_s26, 4  ;;  %460 = sbr.rel (%p2180_p8) target bundleno = 1471 (0x5bf), region = 64  ;;  %s452_s19 = int_to_ptr.vmem [resolvable:$true] %s451_s19 }
  0x3c   : > { %1635 = dma.hbm_to_vmem [thread:$0]  (!%p2222_p11), %s450_s5, 16, %s452_s19, %s2230_s9  }
  0x3d   : > { %s2274_s29 = sand.u32 (!%p2180_p8), 1, %s2033_s18  }
  0x3e   : > { %s2277_s1 = sshll.u32 (!%p2180_p8), %s2274_s29, 4  ;;  %s463_s15 = scalar_lea.sflag (!%p2180_p8), [#allocation3], %s2274_s29 }
  0x3f   : > { %s466_s3 = scalar_lea.vmem (!%p2180_p8), [#allocation2], %s2277_s1 }
  0x40   : > { %2008 = dma.done.wait (%p2167_p4), %s463_s15, 256  }
  0x41   : > { %2010 = vsyncadd (%p2167_p4), %s463_s15, 4294967040  ;;  %s472_s5 = sand.u32 1, %s2158_s23   ;;  %s476_s30 = scalar_lea.vmem [#allocation5], %s2277_s1 }
  0x42   : > { %s473_s9 = scalar_lea.sflag [#allocation6], %s472_s5 }
  0x43   : > { %2012 = dma.done.wait (%p2167_p4), %s473_s9, 272  }
  0x44   : > { %2014 = vsyncadd (%p2167_p4), %s473_s9, 4294967024  ;;  %s485_s16 = scalar_lea.vmem [#allocation7], %s2274_s29 }
  0x45   : > { %2016 = dma.done.wait (%p67_p1), [#allocation9], 1024  }
  0x46   : > { %2018 = vsyncadd (%p67_p1), [#allocation9], 4294966272 }
  0x47   : > { %2020 = dma.done.wait (%p67_p1), [#allocation12], 512  }
  0x48   : > { %2022 = vsyncadd (%p67_p1), [#allocation12], 4294966784  ;;  %v558_v0 = vld [vmem:[#allocation8 + $0x18] sm:$0xff]  ;;  %v557_v1 = vld [vmem:[#allocation8 + $0x10] sm:$0xff]  ;;  %vm563_vm0 = vcmask 261120   ;;  %vm651_vm1 = vcmask 64512   ;;  %v634_v27 = vlaneseq }
  0x49   : > { %1590 = vmatpush.msra.mxu1 %v558_v0  ;;  %582 = vmatpush.msra.mxu0 %v558_v0  ;;  %v556_v2 = vld [vmem:[#allocation8 + $0x8] sm:$0xff]  ;;  %v555_v3 = vld [vmem:[#allocation8] sm:$0xff]  ;;  %v596_v6 = vld [vmem:[#allocation10 + $0x18] sm:$0xff]  ;;  %s2056_s13 = smov 120   ;;  %s2057_s28 = smov 96   ;;  %vm691_vm5 = vcmask 130048  }
  0x4a   : > { %v2300_v4 = vld [vmem:[%s466_s3 + $0x8] sm:$0xff]  ;;  %v2302_v5 = vld [vmem:[%s466_s3] sm:$0xff]  ;;  %s2058_s11 = smov 104   ;;  %s2059_s24 = smov 112   ;;  %v635_v29 = vshrl.u32 %v634_v27, 7  ;;  %v641_v30 = vand.u32 127, %v634_v27 }
  0x4b   : > { %1591 = vmatpush.msra.mxu1 %v557_v1  ;;  %583 = vmatpush.msra.mxu0 %v557_v1  ;;  %v595_v7 = vld [vmem:[#allocation10 + $0x10] sm:$0xff]  ;;  %v594_v8 = vld [vmem:[#allocation10 + $0x8] sm:$0xff]  ;;  %v593_v9 = vld [vmem:[#allocation10] sm:$0xff]  ;;  %v2060_v31 = vmov -1e+30   ;;  %s2061_s12 = smov 88  }
  0x4c   : > { %v553_v10 = vld [vmem:[%s476_s30] sm:$0xff]  ;;  %v554_v11 = vld [vmem:[%s476_s30 + $0x8] sm:$0xff]  ;;  %vm642_vm3 = vcmp.le.s32.totalorder %v641_v30, %v635_v29  ;;  %v636_v35 = vadd.s32 8, %v635_v29  ;;  %s2062_s20 = smov 72   ;;  %s2063_s14 = smov 80  }
  0x4d   : > { %1592 = vmatpush.msra.mxu1 %v556_v2  ;;  %584 = vmatpush.msra.mxu0 %v556_v2  ;;  %v1733_v14 = vld [vmem:[%s2486_s6] ss:$0 sm:$0xff]  ;;  %v644_v34 = vsel %vm642_vm3, 0.0, %v2060_v31  ;;  %v775_v47 = vld [vmem:[#allocation11] sm:$0xff]  ;;  %s2532_s26 = sld [smem:[#allocation21_spill]]  ;;  %s548_s22 = scalar_lea.vmem [#allocation13], %s2277_s1 }
  0x4e   : > { %v1732_v20 = vld [vmem:[%s2484_s4] ss:$0 sm:$0xff]  ;;  %vm643_vm4 = vcmp.le.s32.totalorder %v641_v30, %v636_v35  ;;  %s2533_s3 = sld [smem:[#allocation30_spill]] }
  0x4f   : > { %1593 = vmatpush.msra.mxu1 %v555_v3  ;;  %585 = vmatpush.msra.mxu0 %v555_v3  ;;  %v630_v28 = vld [vmem:[%s485_s16] sm:$0x1]  ;;  %v645_v40 = vsel %vm643_vm4, 0.0, %v2060_v31  ;;  %s2534_s30 = sld [smem:[#allocation31_spill]] }
  0x50   : > { %1547 = vmatmul.msk.f32.vlgmr.msra.gmra.mxu1 %vm563_vm0, %v2300_v4  ;;  %1546 = vmatmul.msk.f32.vlgmr.msra.gmra.mxu0 %vm563_vm0, %v2302_v5  ;;  %vm631_vm2 = vcmp.gt.s32.totalorder %v630_v28, 0 }
  0x51   : > { %619 = vmatpush.msrb.mxu1 %v596_v6  ;;  %v632_v32 = vsel %vm631_vm2, 0.0, %v2060_v31 }
  0x52   : > { %v647_v33 = vperm.slane %v632_v32, 0 }
  0x53   : > { %620 = vmatpush.msrb.mxu1 %v595_v7  ;;  %s1589_s16 = sshll.u32 %s2532_s26, 4 }
  0x54   : > { %v2344_v36 = vadd.f32 %v647_v33, %v644_v34  ;;  %v2348_v42 = vadd.f32 %v647_v33, %v645_v40 }
  0x55   : > { %621 = vmatpush.msrb.mxu1 %v594_v8 }
  0x57   : > { %622 = vmatpush.msrb.mxu1 %v593_v9 }
  0x58   : > { %1548 = vmatmul.msk.f32.vlgmr.msrb.gmra.mxu1 %vm563_vm0, %v553_v10 }
  0x60   : > { %1549 = vmatmul.msk.f32.gmra.mxu1 %vm563_vm0, %v554_v11 }
  0xcd   : > { %v590_v12 = vpop.f32.mrf.mxu1  ;;  %v587_v19 = vpop.f32.mrf.mxu0 }
  0xce   : > { %v2325_v21 = vadd.f32 %v1732_v20, %v587_v19  ;;  %v2332_v22 = vadd.f32 %v1732_v20, %v590_v12 }
  0xd5   : > { %v624_v13 = vpop.f32.mrf.mxu1 }
  0xd6   : > { %v625_v16 = vadd.f32 %v1733_v14, %v624_v13 }
  0xdd   : > { %v627_v15 = vpop.f32.mrf.mxu1 }
  0xde   : > { %v628_v17 = vadd.f32 %v1733_v14, %v627_v15 }
  0xe0   : > { %782 = vrot.lane.b32.xlu2 %v628_v17, %s2056_s13  ;;  %1550 = vmatpush.xpose.msk.msra.mxu2 %vm651_vm1, %v628_v17  ;;  %v2319_v18 = vpack.i.bf16 %v625_v16, %v628_v17 }
  0xe2   : > { %1713 = vrot.lane.b32.xlu1 %v2319_v18, %s2057_s28 }
  0xe4   : > { %1551 = vmatpush.xpose.msk.msra.mxu2 %vm651_vm1, %v625_v16 }
  0xe7   : > { %1552 = vmatmul.msk.f32.vlgmr.msra.gmra.mxu2 %vm651_vm1, %v2325_v21 }
  0xe8   : > { %776 = vrot.lane.b32.xlu2 %v2325_v21, %s2056_s13 }
  0xef   : > { %1553 = vmatmul.msk.f32.gmra.mxu2 %vm651_vm1, %v2332_v22 }
  0xf0   : > { %778 = vrot.lane.b32.xlu2 %v2332_v22, %s2056_s13 }
  0xf8   : > { %1125 = vrot.lane.b32.xlu2 %v625_v16, %s2058_s11 }
 0x100   : > { %962 = vrot.lane.b32.xlu2 %v2325_v21, %s2059_s24 }
 0x13a   : > { %v783_v26 = vpop.permute.xlu2 %782 }
 0x142   : > { %v777_v57 = vpop.permute.xlu2 %776 }
 0x14a   : > { %v779_v60 = vpop.permute.xlu2 %778 }
 0x152   : > { %v1126_v62 = vpop.permute.xlu2 %1125 }
 0x154   : > { %v1714_v23 = vpop.permute.xlu1 %1713 }
 0x155   : > { %v1715_v24 = vunpack.i.l.bf16 %v1714_v23  ;;  %v1716_v25 = vunpack.i.h.bf16 %v1714_v23 }
 0x157   : > { %764 = vmatpush.msrb.mxu2 %v1715_v24  ;;  %1594 = vmatpush.msra.mxu3 %v1715_v24 }
 0x159   : > { %765 = vmatpush.msrb.mxu2 %v1716_v25  ;;  %1595 = vmatpush.msra.mxu3 %v1716_v25 }
 0x15a   : > { %v963_v1 = vpop.permute.xlu2 %962 }
 0x15b   : > { %1556 = vmatpush.xpose.msk.msrb.mxu3 %vm651_vm1, %v783_v26  ;;  %954 = vmatpush.msra.mxu2 %v775_v47 }
 0x16a   : > { %v681_v37 = vpop.f32.mrf.mxu2 }
 0x16b   : > { %v687_v38 = vmul.f32 0.35355338, %v681_v37 }
 0x16d   : > { %v689_v39 = vadd.f32 %v687_v38, %v2344_v36 }
 0x16f   : > { %v692_v41 = vsel %vm691_vm5, %v689_v39, -inf }
 0x170   : > { %693 = vmax.xlane.f32.xlu0 %v692_v41 }
 0x172   : > { %v684_v43 = vpop.f32.mrf.mxu2 }
 0x173   : > { %v688_v44 = vmul.f32 0.35355338, %v684_v43 }
 0x175   : > { %v690_v45 = vadd.f32 %v688_v44, %v2348_v42 }
 0x177   : > { %v695_v46 = vsel %vm691_vm5, %v690_v45, -inf }
 0x178   : > { %696 = vmax.xlane.f32.xlu0 %v695_v46 }
 0x18c   : > { %780 = vrot.lane.b32.xlu0 %v625_v16, %s2056_s13  ;;  %s2535_s13 = sld [smem:[#allocation32_spill]] }
 0x192   : > { %s1367_s27 = scalar_lea.hbm %s2535_s13, %s1589_s16  ;;  %s1975_s10 = scalar_lea.hbm %s2535_s13, 32 }
 0x194   : > { %1127 = vrot.lane.b32.xlu0 %v628_v17, %s2058_s11 }
 0x19c   : > { %968 = vrot.lane.b32.xlu0 %v628_v17, %s2059_s24 }
 0x1a4   : > { %966 = vrot.lane.b32.xlu0 %v625_v16, %s2059_s24 }
 0x1ac   : > { %1123 = vrot.lane.b32.xlu0 %v2332_v22, %s2058_s11 }
 0x1e3   : > { %v694_v48 = vpop.xlane.xlu0 %693 }
 0x1e4   : > { %v698_v49 = vsub.f32 %v689_v39, %v694_v48 }
 0x1e6   : > { %v700_v50 = vmul.f32 1.442695, %v698_v49 }
 0x1e8   : > { %1737 = vpow2.f32 %v700_v50 }
 0x1eb   : > { %v697_v51 = vpop.xlane.xlu0 %696 }
 0x1ec   : > { %v699_v52 = vsub.f32 %v690_v45, %v697_v51 }
 0x1ee   : > { %v1738_v53 = vpop.eup %1737  ;;  %v702_v54 = vmul.f32 1.442695, %v699_v52 }
 0x1ef   : > { %1554 = vmatmul.msk.f32.vlgmr.msrb.gmra.mxu2 %vm691_vm5, %v1738_v53  ;;  %v704_v55 = vsel %vm691_vm5, %v1738_v53, 0.0 }
 0x1f0   : > { %1739 = vpow2.f32 %v702_v54  ;;  %705 = vadd.xlane.f32.xlu1 %v704_v55 }
 0x1f6   : > { %v1740_v56 = vpop.eup %1739 }
 0x1f7   : > { %1555 = vmatmul.msk.f32.vlgmr.msra.gmra.mxu3 %vm691_vm5, %v1740_v56  ;;  %v707_v58 = vsel %vm691_vm5, %v1740_v56, 0.0 }
 0x1f8   : > { %708 = vadd.xlane.f32.xlu2 %v707_v58 }
 0x1fe   : > { %v781_v59 = vpop.permute.xlu0 %780 }
 0x1ff   : > { %1557 = vmatpush.xpose.msk.msrb.mxu3 %vm651_vm1, %v781_v59 }
 0x202   : > { %1558 = vmatmul.msk.f32.vlgmr.msrb.gmra.mxu3 %vm651_vm1, %v777_v57 }
 0x206   : > { %v1128_v61 = vpop.permute.xlu0 %1127 }
 0x207   : > { %1574 = vmatpush.xpose.msk.msrb.mxu2 %vm651_vm1, %v1128_v61 }
 0x209   : > { %1121 = vrot.lane.b32.xlu1 %v2325_v21, %s2058_s11  ;;  %s1368_s11 = sshll.u32 %s548_s22, 4  ;;  %s1369_s11 = int_to_ptr.vmem [resolvable:$true] %s1368_s11 }
 0x20a   : > { %1559 = vmatmul.msk.f32.gmra.mxu3 %vm651_vm1, %v779_v60 }
 0x20b   : > { %1575 = vmatpush.xpose.msk.msrb.mxu2 %vm651_vm1, %v1126_v62 }
 0x20e   : > { %v969_v63 = vpop.permute.xlu0 %968 }
 0x20f   : > { %1566 = vmatpush.xpose.msk.msra.mxu3 %vm651_vm1, %v969_v63 }
 0x210   : > { %964 = vrot.lane.b32.xlu2 %v2332_v22, %s2059_s24  ;;  %s1370_s24 = sshll.u32 %s1367_s27, 4  ;;  %s1371_s24 = int_to_ptr.hbm [resolvable:$true] %s1370_s24 }
 0x211   : > { %1718 = vrot.lane.b32.xlu1 %v2319_v18, %s2061_s12  ;;  %s1354_s12 = scalar_lea.sflag [#allocation4], %s2274_s29 }
 0x216   : > { %v967_v0 = vpop.permute.xlu0 %966 }
 0x217   : > { %1567 = vmatpush.xpose.msk.msra.mxu3 %vm651_vm1, %v967_v0 }
 0x21a   : > { %1568 = vmatmul.msk.f32.vlgmr.msra.gmra.mxu3 %vm651_vm1, %v963_v1 }
 0x21e   : > { %v1124_v43 = vpop.permute.xlu0 %1123 }
 0x263   : > { %v706_v2 = vpop.xlane.xlu1 %705 }
 0x264   : > { %1741 = vrcp.f32 %v706_v2  ;;  %v721_v9 = vand.u32 2147483648, %v706_v2  ;;  %v719_v11 = vand.u32 2147483647, %v706_v2  ;;  %vm715_vm7 = vweird.f32 %v706_v2 }
 0x266   : > { %v722_v14 = vor.u32 1.1754944e-38, %v721_v9  ;;  %vm720_vm9 = vcmp.eq.f32.partialorder %v719_v11, 8.507059e+37 }
 0x26a   : > { %v1742_v3 = vpop.eup %1741 }
 0x26b   : > { %v711_v6 = vmul.f32 %v1742_v3, %v706_v2  ;;  %v709_v7 = vpop.xlane.xlu2 %708  ;;  %vm716_vm6 = vweird.f32 %v1742_v3 }
 0x26c   : > { %1743 = vrcp.f32 %v709_v7  ;;  %vm717_vm8 = vmor %vm715_vm7, %vm716_vm6  ;;  %v735_v23 = vand.u32 2147483648, %v709_v7  ;;  %v733_v25 = vand.u32 2147483647, %v709_v7  ;;  %vm729_vm11 = vweird.f32 %v709_v7 }
 0x26d   : > { %v712_v8 = vsub.f32 1.0, %v711_v6 }
 0x26e   : > { %v736_v27 = vor.u32 1.1754944e-38, %v735_v23  ;;  %vm734_vm13 = vcmp.eq.f32.partialorder %v733_v25, 8.507059e+37 }
 0x26f   : > { %v713_v10 = vmul.f32 %v1742_v3, %v712_v8 }
 0x271   : > { %v714_v12 = vadd.f32 %v1742_v3, %v713_v10 }
 0x272   : > { %v1744_v13 = vpop.eup %1743  ;;  %v767_v20 = vpop.f32.mrf.mxu2 }
 0x273   : > { %v725_v15 = vmul.f32 %v1744_v13, %v709_v7  ;;  %v718_v16 = vsel %vm717_vm8, %v1742_v3, %v714_v12  ;;  %v965_v17 = vpop.permute.xlu2 %964  ;;  %vm730_vm10 = vweird.f32 %v1744_v13 }
 0x274   : > { %v723_v19 = vsel %vm720_vm9, %v722_v14, %v718_v16  ;;  %1569 = vmatmul.msk.f32.gmra.mxu3 %vm651_vm1, %v965_v17  ;;  %vm731_vm12 = vmor %vm729_vm11, %vm730_vm10 }
 0x275   : > { %v726_v21 = vsub.f32 1.0, %v725_v15  ;;  %v773_v22 = vmul.f32 %v767_v20, %v723_v19 }
 0x277   : > { %1564 = vmatmul.msk.f32.vlgmr.msra.gmra.mxu2 %vm651_vm1, %v773_v22  ;;  %v727_v24 = vmul.f32 %v1744_v13, %v726_v21 }
 0x279   : > { %v728_v26 = vadd.f32 %v1744_v13, %v727_v24 }
 0x27a   : > { %v770_v31 = vpop.f32.mrf.mxu3 }
 0x27b   : > { %v732_v28 = vsel %vm731_vm12, %v1744_v13, %v728_v26  ;;  %v1122_v29 = vpop.permute.xlu1 %1121 }
 0x27c   : > { %v737_v30 = vsel %vm734_vm13, %v736_v27, %v732_v28  ;;  %v903_v27 = vld [vmem:[#allocation11 + $0x8] sm:$0xff] }
 0x27d   : > { %v774_v32 = vmul.f32 %v770_v31, %v737_v30  ;;  %925 = vmatpush.msra.mxu1 %v903_v27 }
 0x27f   : > { %1565 = vmatmul.msk.f32.gmra.mxu2 %vm651_vm1, %v774_v32 }
 0x283   : > { %v1719_v33 = vpop.permute.xlu1 %1718 }
 0x284   : > { %v1720_v34 = vunpack.i.l.bf16 %v1719_v33  ;;  %v1721_v38 = vunpack.i.h.bf16 %v1719_v33 }
 0x285   : > { %v809_v35 = vpop.f32.mrf.mxu3 }
 0x286   : > { %v815_v37 = vmul.f32 0.35355338, %v809_v35  ;;  %891 = vmatpush.msrb.mxu0 %v1720_v34 }
 0x287   : > { %1576 = vmatmul.msk.f32.vlgmr.msrb.gmra.mxu2 %vm651_vm1, %v1122_v29 }
 0x288   : > { %892 = vmatpush.msrb.mxu0 %v1721_v38  ;;  %v817_v39 = vadd.f32 %v815_v37, %v2344_v36 }
 0x28a   : > { %v819_v40 = vsel %vm691_vm5, %v817_v39, -inf }
 0x28b   : > { %820 = vmax.xlane.f32.xlu0 %v819_v40 }
 0x28d   : > { %v812_v41 = vpop.f32.mrf.mxu3 }
 0x28e   : > { %v816_v44 = vmul.f32 0.35355338, %v812_v41 }
 0x28f   : > { %1577 = vmatmul.msk.f32.gmra.mxu2 %vm651_vm1, %v1124_v43 }
 0x290   : > { %v818_v45 = vadd.f32 %v816_v44, %v2348_v42 }
 0x292   : > { %v822_v46 = vsel %vm691_vm5, %v818_v45, -inf }
 0x293   : > { %823 = vmax.xlane.f32.xlu2 %v822_v46 }
 0x29d   : > { %v995_v47 = vpop.f32.mrf.mxu3 }
 0x29e   : > { %v1001_v48 = vmul.f32 0.35355338, %v995_v47 }
 0x2a0   : > { %v1003_v49 = vadd.f32 %v1001_v48, %v2344_v36 }
 0x2a2   : > { %v1005_v50 = vsel %vm691_vm5, %v1003_v49, -inf }
 0x2a3   : > { %1006 = vmax.xlane.f32.xlu0 %v1005_v50 }
 0x2b7   : > { %1723 = vrot.lane.b32.xlu0 %v2319_v18, %s2062_s20  ;;  %s1969_s20 = sshra.s32 %s1371_s24, 4  ;;  %s1970_s20 = int_to_ptr.hbm [resolvable:$true] %s1969_s20 }
 0x2b8   : > { %p1976_p8 = scmp.lt.s32.totalorder %s1970_s20, %s2535_s13 }
 0x2f7   : > { %v998_v3 = vpop.f32.mrf.mxu3 }
 0x2f8   : > { %v1002_v8 = vmul.f32 0.35355338, %v998_v3 }
 0x2fa   : > { %v2387_v51 = vpop.f32.mrf.mxu2 }
 0x2fe   : > { %v821_v52 = vpop.xlane.xlu0 %820 }
 0x2ff   : > { %v825_v53 = vsub.f32 %v817_v39, %v821_v52 }
 0x301   : > { %v827_v54 = vmul.f32 1.442695, %v825_v53 }
 0x302   : > { %v2389_v55 = vpop.f32.mrf.mxu2 }
 0x303   : > { %1745 = vpow2.f32 %v827_v54 }
 0x306   : > { %v824_v56 = vpop.xlane.xlu2 %823 }
 0x307   : > { %v826_v57 = vsub.f32 %v818_v45, %v824_v56 }
 0x309   : > { %v1746_v58 = vpop.eup %1745  ;;  %v829_v59 = vmul.f32 1.442695, %v826_v57 }
 0x30a   : > { %1560 = vmatmul.msk.f32.vlgmr.msrb.gmra.mxu0 %vm691_vm5, %v1746_v58  ;;  %v1154_v60 = vpop.f32.mrf.mxu2  ;;  %v831_v15 = vsel %vm691_vm5, %v1746_v58, 0.0 }
 0x30b   : > { %1747 = vpow2.f32 %v829_v59  ;;  %v1160_v61 = vmul.f32 0.35355338, %v1154_v60 }
 0x30d   : > { %v1162_v62 = vadd.f32 %v1160_v61, %v2344_v36  ;;  %v1004_v36 = vadd.f32 %v1002_v8, %v2348_v42  ;;  %v1089_v8 = vld [vmem:[#allocation11 + $0x10] sm:$0xff] }
 0x30e   : > { %1111 = vmatpush.msrb.mxu1 %v1089_v8 }
 0x30f   : > { %v1164_v63 = vsel %vm691_vm5, %v1162_v62, -inf  ;;  %v1008_v12 = vsel %vm691_vm5, %v1004_v36, -inf }
 0x310   : > { %1165 = vmax.xlane.f32.xlu1 %v1164_v63 }
 0x311   : > { %v1748_v0 = vpop.eup %1747 }
 0x312   : > { %1561 = vmatmul.msk.f32.gmra.mxu0 %vm691_vm5, %v1748_v0  ;;  %v1157_v1 = vpop.f32.mrf.mxu2 }
 0x313   : > { %v1161_v2 = vmul.f32 0.35355338, %v1157_v1 }
 0x315   : > { %v1163_v6 = vadd.f32 %v1161_v2, %v2348_v42  ;;  %v834_v42 = vsel %vm691_vm5, %v1748_v0, 0.0 }
 0x316   : > { %v1007_v7 = vpop.xlane.xlu0 %1006 }
 0x317   : > { %v1011_v9 = vsub.f32 %v1003_v49, %v1007_v7  ;;  %v1167_v10 = vsel %vm691_vm5, %v1163_v6, -inf }
 0x318   : > { %1168 = vmax.xlane.f32.xlu2 %v1167_v10 }
 0x319   : > { %v1013_v11 = vmul.f32 1.442695, %v1011_v9 }
 0x31b   : > { %1749 = vpow2.f32 %v1013_v11 }
 0x320   : > { %1009 = vmax.xlane.f32.xlu2 %v1008_v12 }
 0x321   : > { %v1750_v13 = vpop.eup %1749 }
 0x322   : > { %v1017_v14 = vsel %vm691_vm5, %v1750_v13, 0.0 }
 0x323   : > { %1018 = vadd.xlane.f32.xlu0 %v1017_v14 }
 0x328   : > { %832 = vadd.xlane.f32.xlu2 %v831_v15 }
 0x329   : > { %1728 = vrot.lane.b32.xlu1 %v2319_v18, %s2063_s14  ;;  %v1724_v16 = vpop.permute.xlu0 %1723  ;;  %s1971_s14 = scalar_lea.hbm %s1970_s20, 16 }
 0x32a   : > { %v1725_v17 = vunpack.i.l.bf16 %v1724_v16  ;;  %v1726_v19 = vunpack.i.h.bf16 %v1724_v16  ;;  %p1972_p1 = scmp.ne.s32.totalorder %s1970_s20, %s1971_s14  ;;  %p1977_p10 = scmp.lt.s32.totalorder %s1975_s10, %s1971_s14 }
 0x32c   : > { %1236 = vmatpush.msrb.mxu3 %v1725_v17  ;;  %p1973_p2 = pnand %p1972_p1, %p2207_p5  ;;  %p1978_p11 = por %p1977_p10, %p1976_p8 }
 0x32e   : > { %1237 = vmatpush.msrb.mxu3 %v1726_v19  ;;  %p1974_p4 = pneg %p1973_p2 }
 0x330   : > { %835 = vadd.xlane.f32.xlu2 %v834_v42  ;;  %p1979_p12 = pnand %p1978_p11, %p1974_p4 }
 0x383   : > { %v1166_v20 = vpop.xlane.xlu1 %1165 }
 0x384   : > { %v1170_v21 = vsub.f32 %v1162_v62, %v1166_v20 }
 0x386   : > { %v1172_v22 = vmul.f32 1.442695, %v1170_v21 }
 0x387   : > { %v894_v50 = vpop.f32.mrf.mxu0 }
 0x388   : > { %1751 = vpow2.f32 %v1172_v22 }
 0x38b   : > { %v1169_v23 = vpop.xlane.xlu2 %1168 }
 0x38c   : > { %v1171_v24 = vsub.f32 %v1163_v6, %v1169_v23  ;;  %v1248_v6 = vld [vmem:[#allocation11 + $0x18] sm:$0xff] }
 0x38e   : > { %v1752_v25 = vpop.eup %1751  ;;  %v1174_v26 = vmul.f32 1.442695, %v1171_v24 }
 0x38f   : > { %1578 = vmatmul.msk.f32.vlgmr.msrb.gmra.mxu3 %vm691_vm5, %v1752_v25  ;;  %v1176_v18 = vsel %vm691_vm5, %v1752_v25, 0.0  ;;  %v897_v1 = vpop.f32.mrf.mxu0 }
 0x390   : > { %1753 = vpow2.f32 %v1174_v26  ;;  %1177 = vadd.xlane.f32.xlu2 %v1176_v18 }
 0x393   : > { %v1010_v28 = vpop.xlane.xlu2 %1009 }
 0x394   : > { %v1012_v29 = vsub.f32 %v1004_v36, %v1010_v28 }
 0x396   : > { %v1754_v30 = vpop.eup %1753  ;;  %v1015_v31 = vmul.f32 1.442695, %v1012_v29  ;;  %v1019_v7 = vpop.xlane.xlu0 %1018 }
 0x397   : > { %1579 = vmatmul.msk.f32.gmra.mxu3 %vm691_vm5, %v1754_v30  ;;  %v1179_v32 = vsel %vm691_vm5, %v1754_v30, 0.0 }
 0x398   : > { %1755 = vpow2.f32 %v1015_v31  ;;  %1180 = vadd.xlane.f32.xlu2 %v1179_v32 }
 0x39b   : > { %v1729_v33 = vpop.permute.xlu1 %1728  ;;  %v833_v34 = vpop.xlane.xlu2 %832 }
 0x39c   : > { %v1730_v35 = vunpack.i.l.bf16 %v1729_v33  ;;  %1757 = vrcp.f32 %v833_v34  ;;  %v1731_v38 = vunpack.i.h.bf16 %v1729_v33  ;;  %v848_v45 = vand.u32 2147483648, %v833_v34 }
 0x39d   : > { %v846_v47 = vand.u32 2147483647, %v833_v34  ;;  %vm842_vm15 = vweird.f32 %v833_v34  ;;  %v1034_v33 = vand.u32 2147483648, %v1019_v7 }
 0x39e   : > { %v1756_v37 = vpop.eup %1755  ;;  %1077 = vmatpush.msra.mxu0 %v1730_v35  ;;  %v849_v52 = vor.u32 1.1754944e-38, %v848_v45 }
 0x39f   : > { %v1020_v39 = vsel %vm691_vm5, %v1756_v37, 0.0  ;;  %vm847_vm3 = vcmp.eq.f32.partialorder %v846_v47, 8.507059e+37 }
 0x3a0   : > { %1078 = vmatpush.msra.mxu0 %v1731_v38  ;;  %1021 = vadd.xlane.f32.xlu1 %v1020_v39 }
 0x3a1   : > { %1570 = vmatmul.msk.f32.vlgmr.msra.gmra.mxu0 %vm691_vm5, %v1750_v13 }
 0x3a2   : > { %v1758_v40 = vpop.eup %1757  ;;  %1270 = vmatpush.msrb.mxu0 %v1248_v6 }
 0x3a3   : > { %v838_v41 = vmul.f32 %v1758_v40, %v833_v34  ;;  %v836_v43 = vpop.xlane.xlu2 %835  ;;  %vm843_vm14 = vweird.f32 %v1758_v40 }
 0x3a4   : > { %1759 = vrcp.f32 %v836_v43  ;;  %vm844_vm2 = vmor %vm842_vm15, %vm843_vm14  ;;  %v862_v59 = vand.u32 2147483648, %v836_v43  ;;  %v860_v61 = vand.u32 2147483647, %v836_v43  ;;  %vm856_vm6 = vweird.f32 %v836_v43 }
 0x3a5   : > { %v839_v44 = vsub.f32 1.0, %v838_v41  ;;  %1761 = vrcp.f32 %v1019_v7  ;;  %vm1028_vm14 = vweird.f32 %v1019_v7 }
 0x3a6   : > { %v863_v63 = vor.u32 1.1754944e-38, %v862_v59  ;;  %vm861_vm7 = vcmp.eq.f32.partialorder %v860_v61, 8.507059e+37 }
 0x3a7   : > { %v840_v46 = vmul.f32 %v1758_v40, %v839_v44 }
 0x3a9   : > { %v841_v48 = vadd.f32 %v1758_v40, %v840_v46  ;;  %1571 = vmatmul.msk.f32.gmra.mxu0 %vm691_vm5, %v1756_v37  ;;  %v1032_v37 = vand.u32 2147483647, %v1019_v7  ;;  %v1035_v46 = vor.u32 1.1754944e-38, %v1034_v33 }
 0x3aa   : > { %v1760_v49 = vpop.eup %1759 }
 0x3ab   : > { %v845_v53 = vsel %vm844_vm2, %v1758_v40, %v841_v48  ;;  %v852_v54 = vmul.f32 %v1760_v49, %v836_v43  ;;  %vm857_vm4 = vweird.f32 %v1760_v49  ;;  %v1762_v10 = vpop.eup %1761 }
 0x3ac   : > { %v850_v56 = vsel %vm847_vm3, %v849_v52, %v845_v53  ;;  %vm858_vm5 = vmor %vm856_vm6, %vm857_vm4  ;;  %v1024_v36 = vmul.f32 %v1762_v10, %v1019_v7  ;;  %vm1029_vm12 = vweird.f32 %v1762_v10  ;;  %vm1033_vm6 = vcmp.eq.f32.partialorder %v1032_v37, 8.507059e+37  ;;  %v1734_v7 = vld [vmem:[%s2488_s8] ss:$0 sm:$0xff] }
 0x3ad   : > { %v853_v57 = vsub.f32 1.0, %v852_v54  ;;  %v900_v58 = vmul.f32 %v894_v50, %v850_v56  ;;  %vm2413_vm2 = vmor %vm1028_vm14, %vm1029_vm12 }
 0x3ae   : > { %v1025_v16 = vsub.f32 1.0, %v1024_v36 }
 0x3af   : > { %v854_v60 = vmul.f32 %v1760_v49, %v853_v57  ;;  %1562 = vmatmul.msk.f32.vlgmr.msra.gmra.mxu1 %vm651_vm1, %v900_v58 }
 0x3b0   : > { %v1026_v26 = vmul.f32 %v1762_v10, %v1025_v16 }
 0x3b1   : > { %v855_v62 = vadd.f32 %v1760_v49, %v854_v60 }
 0x3b2   : > { %v1027_v32 = vadd.f32 %v1762_v10, %v1026_v26 }
 0x3b3   : > { %v859_v0 = vsel %vm858_vm5, %v1760_v49, %v855_v62 }
 0x3b4   : > { %v864_v2 = vsel %vm861_vm7, %v863_v63, %v859_v0  ;;  %v1031_v43 = vsel %vm2413_vm2, %v1762_v10, %v1027_v32 }
 0x3b5   : > { %v901_v3 = vmul.f32 %v897_v1, %v864_v2  ;;  %v1036_v49 = vsel %vm1033_vm6, %v1035_v46, %v1031_v43 }
 0x3b7   : > { %1563 = vmatmul.msk.f32.gmra.mxu1 %vm651_vm1, %v901_v3 }
 0x403   : > { %v1178_v9 = vpop.xlane.xlu2 %1177 }
 0x404   : > { %1763 = vrcp.f32 %v1178_v9  ;;  %v1193_v15 = vand.u32 2147483648, %v1178_v9  ;;  %v1191_v19 = vand.u32 2147483647, %v1178_v9  ;;  %vm1187_vm9 = vweird.f32 %v1178_v9 }
 0x406   : > { %v1194_v21 = vor.u32 1.1754944e-38, %v1193_v15  ;;  %vm1192_vm11 = vcmp.eq.f32.partialorder %v1191_v19, 8.507059e+37  ;;  %v2064_v19 = vmov 32.0  }
 0x40a   : > { %v1764_v11 = vpop.eup %1763 }
 0x40b   : > { %v1183_v12 = vmul.f32 %v1764_v11, %v1178_v9  ;;  %v1181_v13 = vpop.xlane.xlu2 %1180  ;;  %vm1188_vm8 = vweird.f32 %v1764_v11 }
 0x40c   : > { %1765 = vrcp.f32 %v1181_v13  ;;  %vm1189_vm10 = vmor %vm1187_vm9, %vm1188_vm8  ;;  %v1207_v29 = vand.u32 2147483648, %v1181_v13  ;;  %v1205_v31 = vand.u32 2147483647, %v1181_v13  ;;  %vm1201_vm15 = vweird.f32 %v1181_v13 }
 0x40d   : > { %v1184_v14 = vsub.f32 1.0, %v1183_v12 }
 0x40e   : > { %v1208_v39 = vor.u32 1.1754944e-38, %v1207_v29  ;;  %vm1206_vm4 = vcmp.eq.f32.partialorder %v1205_v31, 8.507059e+37 }
 0x40f   : > { %v1185_v17 = vmul.f32 %v1764_v11, %v1184_v14 }
 0x411   : > { %v1186_v42 = vadd.f32 %v1764_v11, %v1185_v17 }
 0x412   : > { %v1766_v20 = vpop.eup %1765  ;;  %v1239_v22 = vpop.f32.mrf.mxu3 }
 0x413   : > { %v1197_v23 = vmul.f32 %v1766_v20, %v1181_v13  ;;  %v1190_v24 = vsel %vm1189_vm10, %v1764_v11, %v1186_v42  ;;  %v1022_v25 = vpop.xlane.xlu1 %1021  ;;  %vm1202_vm13 = vweird.f32 %v1766_v20 }
 0x414   : > { %v1195_v27 = vsel %vm1192_vm11, %v1194_v21, %v1190_v24  ;;  %1767 = vrcp.f32 %v1022_v25  ;;  %vm1203_vm3 = vmor %vm1201_vm15, %vm1202_vm13  ;;  %v1048_v54 = vand.u32 2147483648, %v1022_v25  ;;  %vm1042_vm7 = vweird.f32 %v1022_v25 }
 0x415   : > { %v1198_v18 = vsub.f32 1.0, %v1197_v23  ;;  %v1245_v28 = vmul.f32 %v1239_v22, %v1195_v27  ;;  %v1046_v57 = vand.u32 2147483647, %v1022_v25  ;;  %1769 = vrcp.f32 %v2064_v19 }
 0x416   : > { %v1049_v59 = vor.u32 1.1754944e-38, %v1048_v54 }
 0x417   : > { %1580 = vmatmul.msk.f32.vlgmr.msrb.gmra.mxu0 %vm651_vm1, %v1245_v28  ;;  %v1199_v30 = vmul.f32 %v1766_v20, %v1198_v18  ;;  %vm1047_vm9 = vcmp.eq.f32.partialorder %v1046_v57, 8.507059e+37 }
 0x419   : > { %v1200_v34 = vadd.f32 %v1766_v20, %v1199_v30 }
 0x41a   : > { %v1768_v38 = vpop.eup %1767  ;;  %v1242_v45 = vpop.f32.mrf.mxu3 }
 0x41b   : > { %v1038_v40 = vmul.f32 %v1768_v38, %v1022_v25  ;;  %v1204_v41 = vsel %vm1203_vm3, %v1766_v20, %v1200_v34  ;;  %vm1043_vm5 = vweird.f32 %v1768_v38  ;;  %v1770_v42 = vpop.eup %1769 }
 0x41c   : > { %v1209_v44 = vsel %vm1206_vm4, %v1208_v39, %v1204_v41  ;;  %vm1044_vm8 = vmor %vm1042_vm7, %vm1043_vm5  ;;  %v1295_v20 = vmul.f32 32.0, %v1770_v42 }
 0x41d   : > { %v1039_v47 = vsub.f32 1.0, %v1038_v40  ;;  %v1246_v48 = vmul.f32 %v1242_v45, %v1209_v44 }
 0x41e   : > { %v1080_v50 = vpop.f32.mrf.mxu0 }
 0x41f   : > { %v1040_v52 = vmul.f32 %v1768_v38, %v1039_v47  ;;  %v1086_v53 = vmul.f32 %v1080_v50, %v1036_v49  ;;  %1581 = vmatmul.msk.f32.gmra.mxu0 %vm651_vm1, %v1246_v48  ;;  %v1735_v47 = vld [vmem:[%s2533_s3] ss:$0 sm:$0xff] }
 0x420   : > { %v1736_v50 = vld [vmem:[%s2534_s30] ss:$0 sm:$0xff] }
 0x421   : > { %1572 = vmatmul.msk.f32.vlgmr.msrb.gmra.mxu1 %vm651_vm1, %v1086_v53  ;;  %v1041_v56 = vadd.f32 %v1768_v38, %v1040_v52 }
 0x423   : > { %v1045_v58 = vsel %vm1044_vm8, %v1768_v38, %v1041_v56 }
 0x424   : > { %v1050_v60 = vsel %vm1047_vm9, %v1049_v59, %v1045_v58 }
 0x426   : > { %v1083_v61 = vpop.f32.mrf.mxu0 }
 0x427   : > { %v1087_v62 = vmul.f32 %v1083_v61, %v1050_v60 }
 0x429   : > { %1573 = vmatmul.msk.f32.gmra.mxu1 %vm651_vm1, %v1087_v62  ;;  %vm1299_vm1 = vweird.f32 %v1770_v42 }
 0x42c   : > { %v927_v63 = vpop.f32.mrf.mxu1 }
 0x42d   : > { %v957_v1 = vadd.f32 %v2387_v51, %v927_v63 }
 0x434   : > { %v930_v0 = vpop.f32.mrf.mxu1 }
 0x435   : > { %v960_v10 = vadd.f32 %v2389_v55, %v930_v0  ;;  %v1296_v55 = vsub.f32 1.0, %v1295_v20 }
 0x437   : > { %v1297_v21 = vmul.f32 %v1770_v42, %v1296_v55 }
 0x494   : > { %v1272_v2 = vpop.f32.mrf.mxu0 }
 0x49c   : > { %v1275_v14 = vpop.f32.mrf.mxu0 }
 0x49e   : > { %v1113_v3 = vpop.f32.mrf.mxu1 }
 0x49f   : > { %v1119_v6 = vadd.f32 %v1113_v3, %v957_v1 }
 0x4a1   : > { %v1278_v8 = vadd.f32 %v1272_v2, %v1119_v6 }
 0x4a3   : > { %v1284_v9 = vadd.f32 %v1734_v7, %v1278_v8 }
 0x4a5   : > { %v1286_v11 = vadd.f32 %v1284_v9, %v2302_v5  ;;  %v1298_v5 = vadd.f32 %v1770_v42, %v1297_v21 }
 0x4a6   : > { %v1116_v36 = vpop.f32.mrf.mxu1 }
 0x4a7   : > { %v1120_v12 = vadd.f32 %v1116_v36, %v960_v10  ;;  %v1288_v13 = vsel %vm563_vm0, %v1286_v11, 0.0  ;;  %v1300_v22 = vsel %vm1299_vm1, %v1770_v42, %v1298_v5 }
 0x4a8   : > { %1289 = vadd.xlane.f32.xlu2 %v1288_v13 }
 0x4a9   : > { %v1279_v51 = vadd.f32 %v1275_v14, %v1120_v12 }
 0x4ab   : > { %v1285_v15 = vadd.f32 %v1734_v7, %v1279_v51 }
 0x4ad   : > { %v1287_v16 = vadd.f32 %v1285_v15, %v2300_v4 }
 0x4af   : > { %v1291_v17 = vsel %vm563_vm0, %v1287_v16, 0.0 }
 0x4b0   : > { %1292 = vadd.xlane.f32.xlu2 %v1291_v17 }
 0x51b   : > { %v1290_v23 = vpop.xlane.xlu2 %1289 }
 0x51c   : > { %v1301_v24 = vmul.f32 %v1300_v22, %v1290_v23 }
 0x51e   : > { %v1303_v25 = vsub.f32 %v1286_v11, %v1301_v24 }
 0x520   : > { %v1305_v26 = vmul.f32 %v1303_v25, %v1303_v25 }
 0x522   : > { %v1307_v27 = vsel %vm563_vm0, %v1305_v26, 0.0 }
 0x523   : > { %1308 = vadd.xlane.f32.xlu2 %v1307_v27  ;;  %v1293_v4 = vpop.xlane.xlu2 %1292 }
 0x524   : > { %v1302_v18 = vmul.f32 %v1300_v22, %v1293_v4 }
 0x526   : > { %v1304_v28 = vsub.f32 %v1287_v16, %v1302_v18 }
 0x528   : > { %v1306_v29 = vmul.f32 %v1304_v28, %v1304_v28 }
 0x52a   : > { %v1310_v30 = vsel %vm563_vm0, %v1306_v29, 0.0 }
 0x52b   : > { %1311 = vadd.xlane.f32.xlu0 %v1310_v30 }
 0x596   : > { %v1309_v31 = vpop.xlane.xlu2 %1308 }
 0x597   : > { %v1313_v32 = vmul.f32 %v1309_v31, %v1300_v22 }
 0x599   : > { %v1315_v33 = vadd.f32 1e-05, %v1313_v32 }
 0x59b   : > { %1771 = vrsqrt.f32 %v1315_v33  ;;  %vm1323_vm11 = vweird.f32 %v1315_v33 }
 0x59e   : > { %v1312_v34 = vpop.xlane.xlu0 %1311 }
 0x59f   : > { %v1314_v35 = vmul.f32 %v1312_v34, %v1300_v22 }
 0x5a1   : > { %v1772_v37 = vpop.eup %1771  ;;  %v1316_v38 = vadd.f32 1e-05, %v1314_v35 }
 0x5a2   : > { %v1318_v39 = vmul.f32 %v1772_v37, %v1315_v33  ;;  %vm1324_vm10 = vweird.f32 %v1772_v37 }
 0x5a3   : > { %1773 = vrsqrt.f32 %v1316_v38  ;;  %vm1325_vm12 = vmor %vm1323_vm11, %vm1324_vm10  ;;  %vm1333_vm14 = vweird.f32 %v1316_v38 }
 0x5a4   : > { %v1319_v40 = vmul.f32 %v1772_v37, %v1318_v39 }
 0x5a6   : > { %v1320_v41 = vmul.f32 0.5, %v1319_v40 }
 0x5a8   : > { %v1321_v43 = vsub.f32 1.5, %v1320_v41 }
 0x5a9   : > { %v1774_v44 = vpop.eup %1773 }
 0x5aa   : > { %v1322_v45 = vmul.f32 %v1772_v37, %v1321_v43  ;;  %v1328_v46 = vmul.f32 %v1774_v44, %v1316_v38  ;;  %vm1334_vm13 = vweird.f32 %v1774_v44 }
 0x5ab   : > { %vm1335_vm15 = vmor %vm1333_vm14, %vm1334_vm13 }
 0x5ac   : > { %v1326_v48 = vsel %vm1325_vm12, %v1772_v37, %v1322_v45  ;;  %v1329_v49 = vmul.f32 %v1774_v44, %v1328_v46 }
 0x5ad   : > { %v1337_v52 = vmul.f32 %v1326_v48, %v1303_v25 }
 0x5ae   : > { %v1330_v53 = vmul.f32 0.5, %v1329_v49 }
 0x5af   : > { %v1343_v54 = vmul.f32 %v1735_v47, %v1337_v52 }
 0x5b0   : > { %v1331_v56 = vsub.f32 1.5, %v1330_v53 }
 0x5b1   : > { %v1349_v57 = vadd.f32 %v1736_v50, %v1343_v54 }
 0x5b2   : > { %v1332_v58 = vmul.f32 %v1774_v44, %v1331_v56 }
 0x5b3   : > { %1351 = vst.msk [vmem:[%s548_s22] sm:$0xff] %vm563_vm0, %v1349_v57 }
 0x5b4   : > { %v1336_v59 = vsel %vm1335_vm15, %v1774_v44, %v1332_v58 }
 0x5b5   : > { %v1338_v60 = vmul.f32 %v1336_v59, %v1304_v28 }
 0x5b7   : > { %v1344_v61 = vmul.f32 %v1735_v47, %v1338_v60 }
 0x5b9   : > { %v1350_v62 = vadd.f32 %v1736_v50, %v1344_v61 }
 0x5bb   : > { %1352 = vst.msk [vmem:[%s548_s22 + $0x8] sm:$0xff] %vm563_vm0, %v1350_v62 }
 0x5bc   : > { %1982 = shalt.err (!%p1979_p12)
}
 0x5bd   : > { %s2065_s29 = smov 128   ;;  %s2066_s15 = smov 8  }
 0x5be   : > { %1614 = dma.vmem_to_hbm [thread:$0]  (%p2207_p5), %s1369_s11, 256, %s1371_s24, %s1354_s12, %s2065_s29, %s2065_s29, %s2066_s15  }
 0x5bf PF: > { %s2537_s3 = sld [smem:[#allocation19_spill]] }
 0x5c0   : > { %s2539_s9 = sld [smem:[#allocation22_spill]] }
 0x5c5   : > { %s1385_s30 = sand.u32 1, %s2537_s3  }
 0x5c6   : > { %p2540_p13 = scmp.ge.s32.totalorder %s2539_s9, 2  ;;  %s1386_s16 = scalar_lea.sflag [#allocation4], %s1385_s30 }
 0x5c8   : > { %p1637_p0 = pnand %p2540_p13, %p2172_p6 }
 0x5ca   : > { %p1638_p3 = pneg %p1637_p0 }
 0x5cc   : > { %2024 = dma.done.wait (%p1638_p3), %s1386_s16, 256  }
 0x5cd   : > { %2026 = vsyncadd (%p1638_p3), %s1386_s16, 4294967040  ;;  %s32_s22 = sadd.s32 1, %s2539_s9   ;;  %s2541_s23 = sld [smem:[#allocation20_spill]] }
 0x5ce   : > { %p29_p7 = scmp.ge.s32.totalorder %s32_s22, 4   ;;  %s2542_s19 = sld [smem:[#allocation26_spill]] }
 0x5cf   : > { %s2543_s25 = sld [smem:[#allocation24_spill]]  ;;  %s2544_s17 = smov %s2033_s18 }
 0x5d0   : > { %s2546_s20 = smov %s2045_s21 }
 0x5d1   :  { %31 = sbr.rel (!%p29_p7) target bundleno = 17 (0x11), region = 148 }
 0x5d3   : > { %s2545_s18 = smov %s2541_s23 }
 0x5d5   : > { %s2547_s21 = smov %s2543_s25 }
 0x5d6   :  { %1392 = vsyncpa [#allocation3], 1 }
 0x5d7   :  { %1394 = vsyncpa [#allocation3 + $0x1], 1 }
 0x5d8   :  { %1395 = vsyncpa [#allocation6], 1 }
 0x5d9   :  { %1397 = vsyncpa [#allocation6 + $0x1], 1 }
 0x5da   :  { %1398 = vsyncpa [#allocation9], 1 }
 0x5db   :  { %1399 = vsyncpa [#allocation12], 1 }
 0x5dc   :  { %1400 = vsyncpa [#allocation4], 1 }
 0x5dd   :  { %1402 = vsyncpa [#allocation4 + $0x1], 1 }

</bundles_post_ra>
